<compile_context>
chip_gen: v5e
topology: v5e:2x2
jax: 0.10.0
libtpu: 0.0.40
codegen_flags: <defaults>
</compile_context>

<pallas_src>
import functools
import math

import jax
import jax.numpy as jnp
from jax.experimental import pallas as pl
from jax.experimental.pallas import tpu as pltpu


# ---------------------------------------------------------------------------
# tiling helper
# ---------------------------------------------------------------------------

def _pick_tile(n, target, align):
    """Largest tile <= target that divides n and is a multiple of `align`;
    falls back to the full dimension (always legal for BlockSpec)."""
    if n <= target:
        return n
    t = (target // align) * align
    while t >= align:
        if n % t == 0:
            return t
        t -= align
    return n


# ---------------------------------------------------------------------------
# fused RMSNorm + matmul   (used for QKV projection and final logits)
# ---------------------------------------------------------------------------

def _norm_matmul_kernel(x_ref, g_ref, w_ref, o_ref, *, eps):
    x = x_ref[...].astype(jnp.float32)                       # (tm, D)
    ms = jnp.mean(x * x, axis=-1, keepdims=True)
    xn = (x * jax.lax.rsqrt(ms + eps)) * g_ref[...].astype(jnp.float32)
    o_ref[...] = jnp.dot(xn.astype(w_ref.dtype), w_ref[...],
                         preferred_element_type=jnp.float32).astype(o_ref.dtype)


def norm_matmul(x2d, gamma, w, eps, *, tm_target=256, tn_target=512):
    """out = rmsnorm(x2d; gamma) @ w.   x2d: (M, D) f32, w: (D, N) bf16."""
    M, D = x2d.shape
    _, N = w.shape
    tm = _pick_tile(M, tm_target, 8)
    tn = _pick_tile(N, tn_target, 128)
    return pl.pallas_call(
        functools.partial(_norm_matmul_kernel, eps=eps),
        out_shape=jax.ShapeDtypeStruct((M, N), jnp.float32),
        grid=(M // tm, N // tn),
        in_specs=[pl.BlockSpec((tm, D), lambda i, j: (i, 0)),
                  pl.BlockSpec((1, D), lambda i, j: (0, 0)),
                  pl.BlockSpec((D, tn), lambda i, j: (0, j))],
        out_specs=pl.BlockSpec((tm, tn), lambda i, j: (i, j)),
        compiler_params=pltpu.CompilerParams(
            dimension_semantics=("parallel", "parallel")),
    )(x2d, gamma.reshape(1, D), w)


# ---------------------------------------------------------------------------
# matmul + residual   (wo projection:  h = x_residual + attn @ wo)
# ---------------------------------------------------------------------------

def _matmul_residual_kernel(x_ref, w_ref, r_ref, o_ref):
    y = jnp.dot(x_ref[...].astype(w_ref.dtype), w_ref[...],
                preferred_element_type=jnp.float32)
    o_ref[...] = (r_ref[...].astype(jnp.float32) + y).astype(o_ref.dtype)


def matmul_residual(x2d, w, residual, *, tm_target=256, tn_target=512):
    """out = residual + x2d @ w.   x2d: (M, K) f32, w: (K, N) bf16."""
    M, K = x2d.shape
    _, N = w.shape
    tm = _pick_tile(M, tm_target, 8)
    tn = _pick_tile(N, tn_target, 128)
    return pl.pallas_call(
        _matmul_residual_kernel,
        out_shape=jax.ShapeDtypeStruct((M, N), jnp.float32),
        grid=(M // tm, N // tn),
        in_specs=[pl.BlockSpec((tm, K), lambda i, j: (i, 0)),
                  pl.BlockSpec((K, tn), lambda i, j: (0, j)),
                  pl.BlockSpec((tm, tn), lambda i, j: (i, j))],
        out_specs=pl.BlockSpec((tm, tn), lambda i, j: (i, j)),
        compiler_params=pltpu.CompilerParams(
            dimension_semantics=("parallel", "parallel")),
    )(x2d, w, residual)


# ---------------------------------------------------------------------------
# fused FFN:  out = x + (silu(rmsnorm(x) @ w1) * (rmsnorm(x) @ w3)) @ w2
# grid = (M tiles, H tiles);  H is the reduction axis (f32 VMEM accumulator).
# ---------------------------------------------------------------------------

def _ffn_kernel(x_ref, g_ref, w1_ref, w3_ref, w2_ref, o_ref, acc_ref, *, eps):
    j = pl.program_id(1)

    @pl.when(j == 0)
    def _():
        acc_ref[...] = jnp.zeros_like(acc_ref)

    x = x_ref[...].astype(jnp.float32)                       # (tm, D)
    ms = jnp.mean(x * x, axis=-1, keepdims=True)
    xn = ((x * jax.lax.rsqrt(ms + eps)) * g_ref[...].astype(jnp.float32)
          ).astype(w1_ref.dtype)
    h1 = jnp.dot(xn, w1_ref[...], preferred_element_type=jnp.float32)
    h3 = jnp.dot(xn, w3_ref[...], preferred_element_type=jnp.float32)
    gate = h1 * jax.nn.sigmoid(h1) * h3                      # silu gating (f32)
    acc_ref[...] += jnp.dot(gate.astype(w2_ref.dtype), w2_ref[...],
                            preferred_element_type=jnp.float32)

    @pl.when(j == pl.num_programs(1) - 1)
    def _():
        o_ref[...] = (x + acc_ref[...]).astype(o_ref.dtype)


def swiglu_ffn(x2d, gamma, w1, w3, w2, eps, *, tm_target=128, th_target=256):
    M, D = x2d.shape
    H = w1.shape[1]
    tm = _pick_tile(M, tm_target, 8)
    th = _pick_tile(H, th_target, 128)
    return pl.pallas_call(
        functools.partial(_ffn_kernel, eps=eps),
        out_shape=jax.ShapeDtypeStruct((M, D), jnp.float32),
        grid=(M // tm, H // th),
        in_specs=[pl.BlockSpec((tm, D), lambda i, j: (i, 0)),
                  pl.BlockSpec((1, D), lambda i, j: (0, 0)),
                  pl.BlockSpec((D, th), lambda i, j: (0, j)),
                  pl.BlockSpec((D, th), lambda i, j: (0, j)),
                  pl.BlockSpec((th, D), lambda i, j: (j, 0))],
        out_specs=pl.BlockSpec((tm, D), lambda i, j: (i, 0)),
        scratch_shapes=[pltpu.VMEM((tm, D), jnp.float32)],
        compiler_params=pltpu.CompilerParams(
            dimension_semantics=("parallel", "arbitrary")),
    )(x2d, gamma.reshape(1, D), w1, w3, w2)


# ---------------------------------------------------------------------------
# flash-style causal attention (online softmax, causal KV-block skipping)
# q, k, v: (B*H, S, Dh) -> (B*H, S, Dh)
# ---------------------------------------------------------------------------

def _flash_kernel(q_ref, k_ref, v_ref, o_ref, m_sc, l_sc, acc_sc,
                  *, scale, tq, tk):
    qi = pl.program_id(1)
    kv = pl.program_id(2)

    @pl.when(kv == 0)
    def _():
        m_sc[...] = jnp.full_like(m_sc, -jnp.inf)
        l_sc[...] = jnp.zeros_like(l_sc)
        acc_sc[...] = jnp.zeros_like(acc_sc)

    # Skip KV blocks entirely above the causal diagonal.
    @pl.when(kv * tk <= qi * tq + (tq - 1))
    def _():
        q = q_ref[0].astype(jnp.bfloat16)                    # (tq, Dh)
        k = k_ref[0].astype(jnp.bfloat16)                    # (tk, Dh)
        s = jax.lax.dot_general(q, k, (((1,), (1,)), ((), ())),
                                preferred_element_type=jnp.float32) * scale
        rows = qi * tq + jax.lax.broadcasted_iota(jnp.int32, (tq, tk), 0)
        cols = kv * tk + jax.lax.broadcasted_iota(jnp.int32, (tq, tk), 1)
        s = jnp.where(rows >= cols, s, -jnp.inf)             # right-aligned causal
        m_prev = m_sc[...]
        m_new = jnp.maximum(m_prev, jnp.max(s, axis=-1, keepdims=True))
        alpha = jnp.exp(m_prev - m_new)
        p = jnp.exp(s - m_new)
        l_sc[...] = alpha * l_sc[...] + jnp.sum(p, axis=-1, keepdims=True)
        acc_sc[...] = alpha * acc_sc[...] + jnp.dot(
            p.astype(jnp.bfloat16), v_ref[0].astype(jnp.bfloat16),
            preferred_element_type=jnp.float32)
        m_sc[...] = m_new

    @pl.when(kv == pl.num_programs(2) - 1)
    def _():
        o_ref[0] = (acc_sc[...] *
                    pl.reciprocal(l_sc[...], approx=True)).astype(o_ref.dtype)


def flash_attention(q, k, v, scale):
    BH, S, Dh = q.shape
    tq = _pick_tile(S, 128, 8)
    tk = _pick_tile(S, 128, 8)
    return pl.pallas_call(
        functools.partial(_flash_kernel, scale=scale, tq=tq, tk=tk),
        out_shape=jax.ShapeDtypeStruct((BH, S, Dh), jnp.float32),
        grid=(BH, S // tq, S // tk),
        in_specs=[pl.BlockSpec((1, tq, Dh), lambda b, i, j: (b, i, 0)),
                  pl.BlockSpec((1, tk, Dh), lambda b, i, j: (b, j, 0)),
                  pl.BlockSpec((1, tk, Dh), lambda b, i, j: (b, j, 0))],
        out_specs=pl.BlockSpec((1, tq, Dh), lambda b, i, j: (b, i, 0)),
        scratch_shapes=[pltpu.VMEM((tq, 1), jnp.float32),
                        pltpu.VMEM((tq, 1), jnp.float32),
                        pltpu.VMEM((tq, Dh), jnp.float32)],
        compiler_params=pltpu.CompilerParams(
            dimension_semantics=("parallel", "parallel", "arbitrary")),
    )(q, k, v)


# ---------------------------------------------------------------------------
# JAX glue: RoPE (half-split layout), params, full forward
# ---------------------------------------------------------------------------

def precompute_freqs_cis(head_dim, end, theta=10000.0):
    freqs = 1.0 / (theta ** (jnp.arange(0, head_dim, 2, dtype=jnp.float32) / head_dim))
    t = jnp.arange(end, dtype=jnp.float32)
    freqs = jnp.outer(t, freqs)                              # (end, head_dim/2)
    return jnp.cos(freqs), jnp.sin(freqs)


def _rope_perm(n_heads, head_dim):
    # Within each head: [0,2,4,...,Dh-2, 1,3,...,Dh-1] (even lanes then odd).
    base = jnp.arange(head_dim).reshape(head_dim // 2, 2).T.reshape(-1)
    return (jnp.arange(n_heads)[:, None] * head_dim + base[None, :]).reshape(-1)


def apply_rope_halfsplit(x, cos, sin):
    # x: (B, S, H, Dh) in half-split ("real half | imag half") layout.
    # Identical attention scores to torch's interleaved view_as_complex RoPE
    # because wq/wk columns were permuted consistently at build time.
    half = x.shape[-1] // 2
    xr, xi = x[..., :half], x[..., half:]
    c = cos[None, :, None, :]
    s = sin[None, :, None, :]
    return jnp.concatenate([xr * c - xi * s, xr * s + xi * c], axis=-1)


def ffn_hidden_dim(dim, multiple_of):
    hidden = 4 * dim
    hidden = int(2 * hidden / 3)
    return multiple_of * ((hidden + multiple_of - 1) // multiple_of)


def init_params(key, *, vocab, dim, n_heads, n_layers, multiple_of):
    hidden = ffn_hidden_dim(dim, multiple_of)
    head_dim = dim // n_heads
    perm = _rope_perm(n_heads, head_dim)

    def lin(k, fan_in, fan_out):
        bound = 1.0 / math.sqrt(fan_in)   # kaiming_uniform(a=sqrt(5)) bound
        return jax.random.uniform(k, (fan_in, fan_out), jnp.float32, -bound, bound)

    keys = jax.random.split(key, 2 + 9 * n_layers)
    params = {
        "tok_embeddings": jax.random.normal(keys[0], (vocab, dim), jnp.float32) * 0.02,
        "output": lin(keys[1], dim, vocab).astype(jnp.bfloat16),
        "norm": jnp.ones((dim,), jnp.float32),
        "layers": [],
    }
    for l in range(n_layers):
        k = keys[2 + 9 * l: 2 + 9 * (l + 1)]
        wq = lin(k[0], dim, dim)[:, perm]     # permute columns for half-split RoPE
        wk = lin(k[1], dim, dim)[:, perm]
        wv = lin(k[2], dim, dim)
        params["layers"].append({
            "attention_norm": jnp.ones((dim,), jnp.float32),
            "wqkv": jnp.concatenate([wq, wk, wv], axis=1).astype(jnp.bfloat16),
            "wo": lin(k[3], dim, dim).astype(jnp.bfloat16),
            "ffn_norm": jnp.ones((dim,), jnp.float32),
            "w1": lin(k[4], dim, hidden).astype(jnp.bfloat16),
            "w3": lin(k[5], dim, hidden).astype(jnp.bfloat16),
            "w2": lin(k[6], hidden, dim).astype(jnp.bfloat16),
        })
    return params


def transformer_block(x2d, layer, cos, sin, *, B, S, n_heads, norm_eps):
    D = x2d.shape[1]
    Dh = D // n_heads

    # --- attention sublayer (fused RMSNorm + QKV projection) ---
    qkv = norm_matmul(x2d, layer["attention_norm"], layer["wqkv"], norm_eps)
    qkv = qkv.reshape(B, S, 3, n_heads, Dh)
    xq, xk, xv = qkv[:, :, 0], qkv[:, :, 1], qkv[:, :, 2]    # (B, S, H, Dh)
    xq = apply_rope_halfsplit(xq, cos, sin)
    xk = apply_rope_halfsplit(xk, cos, sin)

    qh = xq.transpose(0, 2, 1, 3).reshape(B * n_heads, S, Dh)
    kh = xk.transpose(0, 2, 1, 3).reshape(B * n_heads, S, Dh)
    vh = xv.transpose(0, 2, 1, 3).reshape(B * n_heads, S, Dh)
    attn = flash_attention(qh, kh, vh, 1.0 / math.sqrt(Dh))
    attn2d = attn.reshape(B, n_heads, S, Dh).transpose(0, 2, 1, 3).reshape(B * S, D)

    # residual fused into the wo projection
    h2d = matmul_residual(attn2d, layer["wo"], x2d)

    # --- feed-forward sublayer (norm + SwiGLU + down-proj + residual, fused) ---
    return swiglu_ffn(h2d, layer["ffn_norm"], layer["w1"], layer["w3"],
                      layer["w2"], norm_eps)


def transformer_forward(params, examples, *, n_heads, norm_eps, rope_theta,
                        max_seq_len):
    B, S = examples.shape
    D = params["tok_embeddings"].shape[1]
    Dh = D // n_heads

    # token embedding gather (pure lookup; XLA glue)
    h = jnp.take(params["tok_embeddings"], examples, axis=0)   # (B, S, D)
    h2d = h.reshape(B * S, D).astype(jnp.float32)

    cos_full, sin_full = precompute_freqs_cis(Dh, max_seq_len * 2, theta=rope_theta)
    assert S <= cos_full.shape[0]
    cos, sin = cos_full[:S], sin_full[:S]

    for layer in params["layers"]:
        h2d = transformer_block(h2d, layer, cos, sin,
                                B=B, S=S, n_heads=n_heads, norm_eps=norm_eps)

    # final RMSNorm fused into the logits projection (tiled over vocab)
    logits = norm_matmul(h2d, params["norm"], params["output"], norm_eps)
    V = params["output"].shape[1]
    return logits.reshape(B, S, V)


# ---------------------------------------------------------------------------

if __name__ == "__main__":
    # Small ModelArgs-consistent configuration.
    B, S = 2, 8
    DIM, N_HEADS, N_LAYERS = 64, 4, 2
    VOCAB, MULTIPLE_OF = 256, 32
    NORM_EPS, ROPE_THETA = 1e-5, 10000.0
    MAX_SEQ_LEN = 2048

    key = jax.random.PRNGKey(0)
    k_tok, k_par = jax.random.split(key)
    examples = jax.random.randint(k_tok, (B, S), 0, VOCAB, dtype=jnp.int32)

    params = init_params(k_par, vocab=VOCAB, dim=DIM, n_heads=N_HEADS,
                         n_layers=N_LAYERS, multiple_of=MULTIPLE_OF)

    fwd = jax.jit(functools.partial(transformer_forward, n_heads=N_HEADS,
                                    norm_eps=NORM_EPS, rope_theta=ROPE_THETA,
                                    max_seq_len=MAX_SEQ_LEN))
    out = fwd(params, examples)
    out = jax.block_until_ready(out)
    assert out.shape == (B, S, VOCAB), out.shape
    assert bool(jnp.all(jnp.isfinite(out)))
    print("KERNEL_OK")
</pallas_src>

<mosaic_0001>
module attributes {stable_mosaic.version = 11 : i64} {
  func.func @_norm_matmul_kernel(%arg0: i32, %arg1: i32, %arg2: memref<16x64xf32, #tpu.memory_space<vmem>>, %arg3: memref<1x64xf32, #tpu.memory_space<vmem>>, %arg4: memref<64x192xbf16, #tpu.memory_space<vmem>>, %arg5: memref<16x192xf32, #tpu.memory_space<vmem>>) attributes {dimension_semantics = [#tpu.dimension_semantics<parallel>, #tpu.dimension_semantics<parallel>], iteration_bounds = array<i64: 1, 1>, scalar_prefetch = 0 : i64, scratch_operands = 0 : i64, tpu.core_type = #tpu.core_type<tc>, window_params = [{transform_indices = @transform_0, window_bounds = array<i64: 16, 64>}, {pipeline_mode = #tpu.pipeline_mode<synchronous>, transform_indices = @transform_1, window_bounds = array<i64: 1, 64>}, {transform_indices = @transform_2, window_bounds = array<i64: 64, 192>}, {transform_indices = @transform_3, window_bounds = array<i64: 16, 192>}]} {
    %c0 = arith.constant 0 : index
    %c0_0 = arith.constant 0 : index
    %0 = vector.load %arg2[%c0, %c0_0] : memref<16x64xf32, #tpu.memory_space<vmem>>, vector<16x64xf32>
    %1 = arith.mulf %0, %0 : vector<16x64xf32>
    %cst = arith.constant dense<0.000000e+00> : vector<16xf32>
    %2 = vector.multi_reduction <add>, %1, %cst [1] : vector<16x64xf32> to vector<16xf32>
    %3 = vector.shape_cast %2 : vector<16xf32> to vector<16x1xf32>
    %cst_1 = arith.constant 6.400000e+01 : f32
    %4 = vector.broadcast %cst_1 : f32 to vector<16x1xf32>
    %5 = arith.divf %3, %4 : vector<16x1xf32>
    %cst_2 = arith.constant 9.99999974E-6 : f32
    %6 = vector.broadcast %cst_2 : f32 to vector<16x1xf32>
    %7 = arith.addf %5, %6 : vector<16x1xf32>
    %8 = math.rsqrt %7 : vector<16x1xf32>
    %9 = vector.broadcast %8 : vector<16x1xf32> to vector<16x64xf32>
    %10 = arith.mulf %0, %9 : vector<16x64xf32>
    %c0_3 = arith.constant 0 : index
    %c0_4 = arith.constant 0 : index
    %11 = vector.load %arg3[%c0_3, %c0_4] : memref<1x64xf32, #tpu.memory_space<vmem>>, vector<1x64xf32>
    %12 = vector.broadcast %11 : vector<1x64xf32> to vector<16x64xf32>
    %13 = arith.mulf %10, %12 : vector<16x64xf32>
    %14 = arith.truncf %13 : vector<16x64xf32> to vector<16x64xbf16>
    %c0_5 = arith.constant 0 : index
    %c0_6 = arith.constant 0 : index
    %15 = vector.load %arg4[%c0_5, %c0_6] : memref<64x192xbf16, #tpu.memory_space<vmem>>, vector<64x192xbf16>
    %cst_7 = arith.constant dense<0.000000e+00> : vector<16x192xf32>
    %16 = tpu.matmul %14, %15, %cst_7 {dimension_numbers = #tpu.dot_dimension_numbers<[1], [0], [0], [1], [0, 0, 1, 1], [], []>} : vector<16x64xbf16>, vector<64x192xbf16>, vector<16x192xf32> -> vector<16x192xf32>
    %c0_8 = arith.constant 0 : index
    %c0_9 = arith.constant 0 : index
    %17 = vector.load %arg5[%c0_8, %c0_9] : memref<16x192xf32, #tpu.memory_space<vmem>>, vector<16x192xf32>
    tpu.vector_store %arg5[%c0_8, %c0_9], %16 {strides = array<i32>} : memref<16x192xf32, #tpu.memory_space<vmem>>, vector<16x192xf32>,
    return
  }
  func.func @transform_0(%arg0: i32, %arg1: i32) -> (i32, i32) {
    %c0_i32 = arith.constant 0 : i32
    %c0_i32_0 = arith.constant 0 : i32
    return %arg0, %c0_i32 : i32, i32
  }
  func.func @transform_1(%arg0: i32, %arg1: i32) -> (i32, i32) {
    %c0_i32 = arith.constant 0 : i32
    %c0_i32_0 = arith.constant 0 : i32
    %c0_i32_1 = arith.constant 0 : i32
    return %c0_i32, %c0_i32_0 : i32, i32
  }
  func.func @transform_2(%arg0: i32, %arg1: i32) -> (i32, i32) {
    %c0_i32 = arith.constant 0 : i32
    %c0_i32_0 = arith.constant 0 : i32
    return %c0_i32, %arg1 : i32, i32
  }
  func.func @transform_3(%arg0: i32, %arg1: i32) -> (i32, i32) {
    %c0_i32 = arith.constant 0 : i32
    return %arg0, %arg1 : i32, i32
  }
}

module attributes {stable_mosaic.version = 11 : i64} {
  func.func @_flash_kernel(%arg0: i32, %arg1: i32, %arg2: i32, %arg3: memref<1x8x16xf32, #tpu.memory_space<vmem>>, %arg4: memref<1x8x16xf32, #tpu.memory_space<vmem>>, %arg5: memref<1x8x16xf32, #tpu.memory_space<vmem>>, %arg6: memref<1x8x16xf32, #tpu.memory_space<vmem>>, %arg7: memref<8x1xf32, #tpu.memory_space<vmem>>, %arg8: memref<8x1xf32, #tpu.memory_space<vmem>>, %arg9: memref<8x16xf32, #tpu.memory_space<vmem>>) attributes {dimension_semantics = [#tpu.dimension_semantics<parallel>, #tpu.dimension_semantics<parallel>, #tpu.dimension_semantics<arbitrary>], iteration_bounds = array<i64: 8, 1, 1>, scalar_prefetch = 0 : i64, scratch_operands = 3 : i64, tpu.core_type = #tpu.core_type<tc>, window_params = [{transform_indices = @transform_0, window_bounds = array<i64: 1, 8, 16>}, {transform_indices = @transform_1, window_bounds = array<i64: 1, 8, 16>}, {transform_indices = @transform_2, window_bounds = array<i64: 1, 8, 16>}, {transform_indices = @transform_3, window_bounds = array<i64: 1, 8, 16>}]} {
    %c0_i32 = arith.constant 0 : i32
    %0 = arith.cmpi eq, %arg2, %c0_i32 : i32
    %1 = arith.extui %0 : i1 to i32
    %c0_i32_0 = arith.constant 0 : i32
    %2 = arith.cmpi ne, %1, %c0_i32_0 : i32
    scf.if %2 {
      %cst = arith.constant 0xFF800000 : f32
      %12 = vector.broadcast %cst : f32 to vector<8x1xf32>
      %c0 = arith.constant 0 : index
      %c0_5 = arith.constant 0 : index
      %13 = vector.load %arg7[%c0, %c0_5] : memref<8x1xf32, #tpu.memory_space<vmem>>, vector<8x1xf32>
      tpu.vector_store %arg7[%c0, %c0_5], %12 {strides = array<i32>} : memref<8x1xf32, #tpu.memory_space<vmem>>, vector<8x1xf32>,
      %cst_6 = arith.constant 0.000000e+00 : f32
      %14 = vector.broadcast %cst_6 : f32 to vector<8x1xf32>
      %c0_7 = arith.constant 0 : index
      %c0_8 = arith.constant 0 : index
      %15 = vector.load %arg8[%c0_7, %c0_8] : memref<8x1xf32, #tpu.memory_space<vmem>>, vector<8x1xf32>
      tpu.vector_store %arg8[%c0_7, %c0_8], %14 {strides = array<i32>} : memref<8x1xf32, #tpu.memory_space<vmem>>, vector<8x1xf32>,
      %cst_9 = arith.constant 0.000000e+00 : f32
      %16 = vector.broadcast %cst_9 : f32 to vector<8x16xf32>
      %c0_10 = arith.constant 0 : index
      %c0_11 = arith.constant 0 : index
      %17 = vector.load %arg9[%c0_10, %c0_11] : memref<8x16xf32, #tpu.memory_space<vmem>>, vector<8x16xf32>
      tpu.vector_store %arg9[%c0_10, %c0_11], %16 {strides = array<i32>} : memref<8x16xf32, #tpu.memory_space<vmem>>, vector<8x16xf32>,
    } else {
    }
    %c8_i32 = arith.constant 8 : i32
    %3 = arith.muli %arg2, %c8_i32 : i32
    %c8_i32_1 = arith.constant 8 : i32
    %4 = arith.muli %arg1, %c8_i32_1 : i32
    %c7_i32 = arith.constant 7 : i32
    %5 = arith.addi %4, %c7_i32 : i32
    %6 = arith.cmpi sle, %3, %5 : i32
    %7 = arith.extui %6 : i1 to i32
    %c0_i32_2 = arith.constant 0 : i32
    %8 = arith.cmpi ne, %7, %c0_i32_2 : i32
    scf.if %8 {
      %c0 = arith.constant 0 : index
      %c0_5 = arith.constant 0 : index
      %c0_6 = arith.constant 0 : index
      %12 = vector.load %arg3[%c0, %c0_5, %c0_6] : memref<1x8x16xf32, #tpu.memory_space<vmem>>, vector<1x8x16xf32>
      %13 = vector.shape_cast %12 : vector<1x8x16xf32> to vector<8x16xf32>
      %14 = arith.truncf %13 : vector<8x16xf32> to vector<8x16xbf16>
      %c0_7 = arith.constant 0 : index
      %c0_8 = arith.constant 0 : index
      %c0_9 = arith.constant 0 : index
      %15 = vector.load %arg4[%c0_7, %c0_8, %c0_9] : memref<1x8x16xf32, #tpu.memory_space<vmem>>, vector<1x8x16xf32>
      %16 = vector.shape_cast %15 : vector<1x8x16xf32> to vector<8x16xf32>
      %17 = arith.truncf %16 : vector<8x16xf32> to vector<8x16xbf16>
      %cst = arith.constant dense<0.000000e+00> : vector<8x8xf32>
      %18 = tpu.matmul %14, %17, %cst {dimension_numbers = #tpu.dot_dimension_numbers<[1], [1], [0], [0], [0, 0, 1, 0], [], []>} : vector<8x16xbf16>, vector<8x16xbf16>, vector<8x8xf32> -> vector<8x8xf32>
      %cst_10 = arith.constant 2.500000e-01 : f32
      %19 = vector.broadcast %cst_10 : f32 to vector<8x8xf32>
      %20 = arith.mulf %18, %19 : vector<8x8xf32>
      %c8_i32_11 = arith.constant 8 : i32
      %21 = arith.muli %arg1, %c8_i32_11 : i32
      %22 = tpu.iota {dimensions = array<i32: 0>} : vector<8x8xi32>
      %23 = vector.broadcast %21 : i32 to vector<8x8xi32>
      %24 = arith.addi %23, %22 : vector<8x8xi32>
      %c8_i32_12 = arith.constant 8 : i32
      %25 = arith.muli %arg2, %c8_i32_12 : i32
      %26 = tpu.iota {dimensions = array<i32: 1>} : vector<8x8xi32>
      %27 = vector.broadcast %25 : i32 to vector<8x8xi32>
      %28 = arith.addi %27, %26 : vector<8x8xi32>
      %29 = arith.cmpi sge, %24, %28 : vector<8x8xi32>
      %cst_13 = arith.constant 0xFF800000 : f32
      %30 = vector.broadcast %cst_13 : f32 to vector<8x8xf32>
      %31 = arith.select %29, %20, %30 : vector<8x8xi1>, vector<8x8xf32>
      %c0_14 = arith.constant 0 : index
      %c0_15 = arith.constant 0 : index
      %32 = vector.load %arg7[%c0_14, %c0_15] : memref<8x1xf32, #tpu.memory_space<vmem>>, vector<8x1xf32>
      %cst_16 = arith.constant dense<0xFF800000> : vector<8xf32>
      %33 = vector.multi_reduction <maximumf>, %31, %cst_16 [1] : vector<8x8xf32> to vector<8xf32>
      %34 = vector.shape_cast %33 : vector<8xf32> to vector<8x1xf32>
      %35 = arith.maximumf %32, %34 : vector<8x1xf32>
      %36 = arith.subf %32, %35 : vector<8x1xf32>
      %37 = math.exp %36 : vector<8x1xf32>
      %38 = vector.broadcast %35 : vector<8x1xf32> to vector<8x8xf32>
      %39 = arith.subf %31, %38 : vector<8x8xf32>
      %40 = math.exp %39 : vector<8x8xf32>
      %c0_17 = arith.constant 0 : index
      %c0_18 = arith.constant 0 : index
      %41 = vector.load %arg8[%c0_17, %c0_18] : memref<8x1xf32, #tpu.memory_space<vmem>>, vector<8x1xf32>
      %42 = arith.mulf %37, %41 : vector<8x1xf32>
      %cst_19 = arith.constant dense<0.000000e+00> : vector<8xf32>
      %43 = vector.multi_reduction <add>, %40, %cst_19 [1] : vector<8x8xf32> to vector<8xf32>
      %44 = vector.shape_cast %43 : vector<8xf32> to vector<8x1xf32>
      %45 = arith.addf %42, %44 : vector<8x1xf32>
      %c0_20 = arith.constant 0 : index
      %c0_21 = arith.constant 0 : index
      %46 = vector.load %arg8[%c0_20, %c0_21] : memref<8x1xf32, #tpu.memory_space<vmem>>, vector<8x1xf32>
      tpu.vector_store %arg8[%c0_20, %c0_21], %45 {strides = array<i32>} : memref<8x1xf32, #tpu.memory_space<vmem>>, vector<8x1xf32>,
      %c0_22 = arith.constant 0 : index
      %c0_23 = arith.constant 0 : index
      %47 = vector.load %arg9[%c0_22, %c0_23] : memref<8x16xf32, #tpu.memory_space<vmem>>, vector<8x16xf32>
      %48 = vector.broadcast %37 : vector<8x1xf32> to vector<8x16xf32>
      %49 = arith.mulf %48, %47 : vector<8x16xf32>
      %50 = arith.truncf %40 : vector<8x8xf32> to vector<8x8xbf16>
      %c0_24 = arith.constant 0 : index
      %c0_25 = arith.constant 0 : index
      %c0_26 = arith.constant 0 : index
      %51 = vector.load %arg5[%c0_24, %c0_25, %c0_26] : memref<1x8x16xf32, #tpu.memory_space<vmem>>, vector<1x8x16xf32>
      %52 = vector.shape_cast %51 : vector<1x8x16xf32> to vector<8x16xf32>
      %53 = arith.truncf %52 : vector<8x16xf32> to vector<8x16xbf16>
      %cst_27 = arith.constant dense<0.000000e+00> : vector<8x16xf32>
      %54 = tpu.matmul %50, %53, %cst_27 {dimension_numbers = #tpu.dot_dimension_numbers<[1], [0], [0], [1], [0, 0, 1, 1], [], []>} : vector<8x8xbf16>, vector<8x16xbf16>, vector<8x16xf32> -> vector<8x16xf32>
      %55 = arith.addf %49, %54 : vector<8x16xf32>
      %c0_28 = arith.constant 0 : index
      %c0_29 = arith.constant 0 : index
      %56 = vector.load %arg9[%c0_28, %c0_29] : memref<8x16xf32, #tpu.memory_space<vmem>>, vector<8x16xf32>
      tpu.vector_store %arg9[%c0_28, %c0_29], %55 {strides = array<i32>} : memref<8x16xf32, #tpu.memory_space<vmem>>, vector<8x16xf32>,
      %c0_30 = arith.constant 0 : index
      %c0_31 = arith.constant 0 : index
      %57 = vector.load %arg7[%c0_30, %c0_31] : memref<8x1xf32, #tpu.memory_space<vmem>>, vector<8x1xf32>
      tpu.vector_store %arg7[%c0_30, %c0_31], %35 {strides = array<i32>} : memref<8x1xf32, #tpu.memory_space<vmem>>, vector<8x1xf32>,
    } else {
    }
    %c0_i32_3 = arith.constant 0 : i32
    %9 = arith.cmpi eq, %arg2, %c0_i32_3 : i32
    %10 = arith.extui %9 : i1 to i32
    %c0_i32_4 = arith.constant 0 : i32
    %11 = arith.cmpi ne, %10, %c0_i32_4 : i32
    scf.if %11 {
      %c0 = arith.constant 0 : index
      %c0_5 = arith.constant 0 : index
      %12 = vector.load %arg9[%c0, %c0_5] : memref<8x16xf32, #tpu.memory_space<vmem>>, vector<8x16xf32>
      %c0_6 = arith.constant 0 : index
      %c0_7 = arith.constant 0 : index
      %13 = vector.load %arg8[%c0_6, %c0_7] : memref<8x1xf32, #tpu.memory_space<vmem>>, vector<8x1xf32>
      %14 = tpu.reciprocal %13 {approx = true} : vector<8x1xf32> -> vector<8x1xf32>
      %15 = vector.broadcast %14 : vector<8x1xf32> to vector<8x16xf32>
      %16 = arith.mulf %12, %15 : vector<8x16xf32>
      %c0_8 = arith.constant 0 : index
      %c0_9 = arith.constant 0 : index
      %c0_10 = arith.constant 0 : index
      %17 = vector.load %arg6[%c0_8, %c0_9, %c0_10] : memref<1x8x16xf32, #tpu.memory_space<vmem>>, vector<1x8x16xf32>
      %18 = vector.shape_cast %17 : vector<1x8x16xf32> to vector<8x16xf32>
      %19 = vector.shape_cast %16 : vector<8x16xf32> to vector<1x8x16xf32>
      tpu.vector_store %arg6[%c0_8, %c0_9, %c0_10], %19 {strides = array<i32>} : memref<1x8x16xf32, #tpu.memory_space<vmem>>, vector<1x8x16xf32>,
    } else {
    }
    return
  }
  func.func @transform_0(%arg0: i32, %arg1: i32, %arg2: i32) -> (i32, i32, i32) {
    %c0_i32 = arith.constant 0 : i32
    %c0_i32_0 = arith.constant 0 : i32
    return %arg0, %arg1, %c0_i32 : i32, i32, i32
  }
  func.func @transform_1(%arg0: i32, %arg1: i32, %arg2: i32) -> (i32, i32, i32) {
    %c0_i32 = arith.constant 0 : i32
    %c0_i32_0 = arith.constant 0 : i32
    return %arg0, %arg2, %c0_i32 : i32, i32, i32
  }
  func.func @transform_2(%arg0: i32, %arg1: i32, %arg2: i32) -> (i32, i32, i32) {
    %c0_i32 = arith.constant 0 : i32
    %c0_i32_0 = arith.constant 0 : i32
    return %arg0, %arg2, %c0_i32 : i32, i32, i32
  }
  func.func @transform_3(%arg0: i32, %arg1: i32, %arg2: i32) -> (i32, i32, i32) {
    %c0_i32 = arith.constant 0 : i32
    %c0_i32_0 = arith.constant 0 : i32
    return %arg0, %arg1, %c0_i32 : i32, i32, i32
  }
}

module attributes {stable_mosaic.version = 11 : i64} {
  func.func @_matmul_residual_kernel(%arg0: i32, %arg1: i32, %arg2: memref<16x64xf32, #tpu.memory_space<vmem>>, %arg3: memref<64x64xbf16, #tpu.memory_space<vmem>>, %arg4: memref<16x64xf32, #tpu.memory_space<vmem>>, %arg5: memref<16x64xf32, #tpu.memory_space<vmem>>) attributes {dimension_semantics = [#tpu.dimension_semantics<parallel>, #tpu.dimension_semantics<parallel>], iteration_bounds = array<i64: 1, 1>, scalar_prefetch = 0 : i64, scratch_operands = 0 : i64, tpu.core_type = #tpu.core_type<tc>, window_params = [{transform_indices = @transform_0, window_bounds = array<i64: 16, 64>}, {transform_indices = @transform_1, window_bounds = array<i64: 64, 64>}, {transform_indices = @transform_2, window_bounds = array<i64: 16, 64>}, {transform_indices = @transform_3, window_bounds = array<i64: 16, 64>}]} {
    %c0 = arith.constant 0 : index
    %c0_0 = arith.constant 0 : index
    %0 = vector.load %arg2[%c0, %c0_0] : memref<16x64xf32, #tpu.memory_space<vmem>>, vector<16x64xf32>
    %1 = arith.truncf %0 : vector<16x64xf32> to vector<16x64xbf16>
    %c0_1 = arith.constant 0 : index
    %c0_2 = arith.constant 0 : index
    %2 = vector.load %arg3[%c0_1, %c0_2] : memref<64x64xbf16, #tpu.memory_space<vmem>>, vector<64x64xbf16>
    %cst = arith.constant dense<0.000000e+00> : vector<16x64xf32>
    %3 = tpu.matmul %1, %2, %cst {dimension_numbers = #tpu.dot_dimension_numbers<[1], [0], [0], [1], [0, 0, 1, 1], [], []>} : vector<16x64xbf16>, vector<64x64xbf16>, vector<16x64xf32> -> vector<16x64xf32>
    %c0_3 = arith.constant 0 : index
    %c0_4 = arith.constant 0 : index
    %4 = vector.load %arg4[%c0_3, %c0_4] : memref<16x64xf32, #tpu.memory_space<vmem>>, vector<16x64xf32>
    %5 = arith.addf %4, %3 : vector<16x64xf32>
    %c0_5 = arith.constant 0 : index
    %c0_6 = arith.constant 0 : index
    %6 = vector.load %arg5[%c0_5, %c0_6] : memref<16x64xf32, #tpu.memory_space<vmem>>, vector<16x64xf32>
    tpu.vector_store %arg5[%c0_5, %c0_6], %5 {strides = array<i32>} : memref<16x64xf32, #tpu.memory_space<vmem>>, vector<16x64xf32>,
    return
  }
  func.func @transform_0(%arg0: i32, %arg1: i32) -> (i32, i32) {
    %c0_i32 = arith.constant 0 : i32
    %c0_i32_0 = arith.constant 0 : i32
    return %arg0, %c0_i32 : i32, i32
  }
  func.func @transform_1(%arg0: i32, %arg1: i32) -> (i32, i32) {
    %c0_i32 = arith.constant 0 : i32
    %c0_i32_0 = arith.constant 0 : i32
    return %c0_i32, %arg1 : i32, i32
  }
  func.func @transform_2(%arg0: i32, %arg1: i32) -> (i32, i32) {
    %c0_i32 = arith.constant 0 : i32
    return %arg0, %arg1 : i32, i32
  }
  func.func @transform_3(%arg0: i32, %arg1: i32) -> (i32, i32) {
    %c0_i32 = arith.constant 0 : i32
    return %arg0, %arg1 : i32, i32
  }
}

module attributes {stable_mosaic.version = 11 : i64} {
  func.func @_norm_matmul_kernel(%arg0: i32, %arg1: i32, %arg2: memref<16x64xf32, #tpu.memory_space<vmem>>, %arg3: memref<1x64xf32, #tpu.memory_space<vmem>>, %arg4: memref<64x192xbf16, #tpu.memory_space<vmem>>, %arg5: memref<16x192xf32, #tpu.memory_space<vmem>>) attributes {dimension_semantics = [#tpu.dimension_semantics<parallel>, #tpu.dimension_semantics<parallel>], iteration_bounds = array<i64: 1, 1>, scalar_prefetch = 0 : i64, scratch_operands = 0 : i64, tpu.core_type = #tpu.core_type<tc>, window_params = [{transform_indices = @transform_0, window_bounds = array<i64: 16, 64>}, {pipeline_mode = #tpu.pipeline_mode<synchronous>, transform_indices = @transform_1, window_bounds = array<i64: 1, 64>}, {transform_indices = @transform_2, window_bounds = array<i64: 64, 192>}, {transform_indices = @transform_3, window_bounds = array<i64: 16, 192>}]} {
    %c0 = arith.constant 0 : index
    %c0_0 = arith.constant 0 : index
    %0 = vector.load %arg2[%c0, %c0_0] : memref<16x64xf32, #tpu.memory_space<vmem>>, vector<16x64xf32>
    %1 = arith.mulf %0, %0 : vector<16x64xf32>
    %cst = arith.constant dense<0.000000e+00> : vector<16xf32>
    %2 = vector.multi_reduction <add>, %1, %cst [1] : vector<16x64xf32> to vector<16xf32>
    %3 = vector.shape_cast %2 : vector<16xf32> to vector<16x1xf32>
    %cst_1 = arith.constant 6.400000e+01 : f32
    %4 = vector.broadcast %cst_1 : f32 to vector<16x1xf32>
    %5 = arith.divf %3, %4 : vector<16x1xf32>
    %cst_2 = arith.constant 9.99999974E-6 : f32
    %6 = vector.broadcast %cst_2 : f32 to vector<16x1xf32>
    %7 = arith.addf %5, %6 : vector<16x1xf32>
    %8 = math.rsqrt %7 : vector<16x1xf32>
    %9 = vector.broadcast %8 : vector<16x1xf32> to vector<16x64xf32>
    %10 = arith.mulf %0, %9 : vector<16x64xf32>
    %c0_3 = arith.constant 0 : index
    %c0_4 = arith.constant 0 : index
    %11 = vector.load %arg3[%c0_3, %c0_4] : memref<1x64xf32, #tpu.memory_space<vmem>>, vector<1x64xf32>
    %12 = vector.broadcast %11 : vector<1x64xf32> to vector<16x64xf32>
    %13 = arith.mulf %10, %12 : vector<16x64xf32>
    %14 = arith.truncf %13 : vector<16x64xf32> to vector<16x64xbf16>
    %c0_5 = arith.constant 0 : index
    %c0_6 = arith.constant 0 : index
    %15 = vector.load %arg4[%c0_5, %c0_6] : memref<64x192xbf16, #tpu.memory_space<vmem>>, vector<64x192xbf16>
    %cst_7 = arith.constant dense<0.000000e+00> : vector<16x192xf32>
    %16 = tpu.matmul %14, %15, %cst_7 {dimension_numbers = #tpu.dot_dimension_numbers<[1], [0], [0], [1], [0, 0, 1, 1], [], []>} : vector<16x64xbf16>, vector<64x192xbf16>, vector<16x192xf32> -> vector<16x192xf32>
    %c0_8 = arith.constant 0 : index
    %c0_9 = arith.constant 0 : index
    %17 = vector.load %arg5[%c0_8, %c0_9] : memref<16x192xf32, #tpu.memory_space<vmem>>, vector<16x192xf32>
    tpu.vector_store %arg5[%c0_8, %c0_9], %16 {strides = array<i32>} : memref<16x192xf32, #tpu.memory_space<vmem>>, vector<16x192xf32>,
    return
  }
  func.func @transform_0(%arg0: i32, %arg1: i32) -> (i32, i32) {
    %c0_i32 = arith.constant 0 : i32
    %c0_i32_0 = arith.constant 0 : i32
    return %arg0, %c0_i32 : i32, i32
  }
  func.func @transform_1(%arg0: i32, %arg1: i32) -> (i32, i32) {
    %c0_i32 = arith.constant 0 : i32
    %c0_i32_0 = arith.constant 0 : i32
    %c0_i32_1 = arith.constant 0 : i32
    return %c0_i32, %c0_i32_0 : i32, i32
  }
  func.func @transform_2(%arg0: i32, %arg1: i32) -> (i32, i32) {
    %c0_i32 = arith.constant 0 : i32
    %c0_i32_0 = arith.constant 0 : i32
    return %c0_i32, %arg1 : i32, i32
  }
  func.func @transform_3(%arg0: i32, %arg1: i32) -> (i32, i32) {
    %c0_i32 = arith.constant 0 : i32
    return %arg0, %arg1 : i32, i32
  }
}

module attributes {stable_mosaic.version = 11 : i64} {
  func.func @_ffn_kernel(%arg0: i32, %arg1: i32, %arg2: memref<16x64xf32, #tpu.memory_space<vmem>>, %arg3: memref<1x64xf32, #tpu.memory_space<vmem>>, %arg4: memref<64x192xbf16, #tpu.memory_space<vmem>>, %arg5: memref<64x192xbf16, #tpu.memory_space<vmem>>, %arg6: memref<192x64xbf16, #tpu.memory_space<vmem>>, %arg7: memref<16x64xf32, #tpu.memory_space<vmem>>, %arg8: memref<16x64xf32, #tpu.memory_space<vmem>>) attributes {dimension_semantics = [#tpu.dimension_semantics<parallel>, #tpu.dimension_semantics<arbitrary>], iteration_bounds = array<i64: 1, 1>, scalar_prefetch = 0 : i64, scratch_operands = 1 : i64, tpu.core_type = #tpu.core_type<tc>, window_params = [{transform_indices = @transform_0, window_bounds = array<i64: 16, 64>}, {pipeline_mode = #tpu.pipeline_mode<synchronous>, transform_indices = @transform_1, window_bounds = array<i64: 1, 64>}, {transform_indices = @transform_2, window_bounds = array<i64: 64, 192>}, {transform_indices = @transform_3, window_bounds = array<i64: 64, 192>}, {transform_indices = @transform_4, window_bounds = array<i64: 192, 64>}, {transform_indices = @transform_5, window_bounds = array<i64: 16, 64>}]} {
    %c0_i32 = arith.constant 0 : i32
    %0 = arith.cmpi eq, %arg1, %c0_i32 : i32
    %1 = arith.extui %0 : i1 to i32
    %c0_i32_0 = arith.constant 0 : i32
    %2 = arith.cmpi ne, %1, %c0_i32_0 : i32
    scf.if %2 {
      %cst_22 = arith.constant 0.000000e+00 : f32
      %38 = vector.broadcast %cst_22 : f32 to vector<16x64xf32>
      %c0_23 = arith.constant 0 : index
      %c0_24 = arith.constant 0 : index
      %39 = vector.load %arg8[%c0_23, %c0_24] : memref<16x64xf32, #tpu.memory_space<vmem>>, vector<16x64xf32>
      tpu.vector_store %arg8[%c0_23, %c0_24], %38 {strides = array<i32>} : memref<16x64xf32, #tpu.memory_space<vmem>>, vector<16x64xf32>,
    } else {
    }
    %c0 = arith.constant 0 : index
    %c0_1 = arith.constant 0 : index
    %3 = vector.load %arg2[%c0, %c0_1] : memref<16x64xf32, #tpu.memory_space<vmem>>, vector<16x64xf32>
    %4 = arith.mulf %3, %3 : vector<16x64xf32>
    %cst = arith.constant dense<0.000000e+00> : vector<16xf32>
    %5 = vector.multi_reduction <add>, %4, %cst [1] : vector<16x64xf32> to vector<16xf32>
    %6 = vector.shape_cast %5 : vector<16xf32> to vector<16x1xf32>
    %cst_2 = arith.constant 6.400000e+01 : f32
    %7 = vector.broadcast %cst_2 : f32 to vector<16x1xf32>
    %8 = arith.divf %6, %7 : vector<16x1xf32>
    %cst_3 = arith.constant 9.99999974E-6 : f32
    %9 = vector.broadcast %cst_3 : f32 to vector<16x1xf32>
    %10 = arith.addf %8, %9 : vector<16x1xf32>
    %11 = math.rsqrt %10 : vector<16x1xf32>
    %12 = vector.broadcast %11 : vector<16x1xf32> to vector<16x64xf32>
    %13 = arith.mulf %3, %12 : vector<16x64xf32>
    %c0_4 = arith.constant 0 : index
    %c0_5 = arith.constant 0 : index
    %14 = vector.load %arg3[%c0_4, %c0_5] : memref<1x64xf32, #tpu.memory_space<vmem>>, vector<1x64xf32>
    %15 = vector.broadcast %14 : vector<1x64xf32> to vector<16x64xf32>
    %16 = arith.mulf %13, %15 : vector<16x64xf32>
    %17 = arith.truncf %16 : vector<16x64xf32> to vector<16x64xbf16>
    %c0_6 = arith.constant 0 : index
    %c0_7 = arith.constant 0 : index
    %18 = vector.load %arg4[%c0_6, %c0_7] : memref<64x192xbf16, #tpu.memory_space<vmem>>, vector<64x192xbf16>
    %cst_8 = arith.constant dense<0.000000e+00> : vector<16x192xf32>
    %19 = tpu.matmul %17, %18, %cst_8 {dimension_numbers = #tpu.dot_dimension_numbers<[1], [0], [0], [1], [0, 0, 1, 1], [], []>} : vector<16x64xbf16>, vector<64x192xbf16>, vector<16x192xf32> -> vector<16x192xf32>
    %c0_9 = arith.constant 0 : index
    %c0_10 = arith.constant 0 : index
    %20 = vector.load %arg5[%c0_9, %c0_10] : memref<64x192xbf16, #tpu.memory_space<vmem>>, vector<64x192xbf16>
    %cst_11 = arith.constant dense<0.000000e+00> : vector<16x192xf32>
    %21 = tpu.matmul %17, %20, %cst_11 {dimension_numbers = #tpu.dot_dimension_numbers<[1], [0], [0], [1], [0, 0, 1, 1], [], []>} : vector<16x64xbf16>, vector<64x192xbf16>, vector<16x192xf32> -> vector<16x192xf32>
    %22 = arith.negf %19 : vector<16x192xf32>
    %23 = math.exp %22 : vector<16x192xf32>
    %cst_12 = arith.constant 1.000000e+00 : f32
    %24 = vector.broadcast %cst_12 : f32 to vector<16x192xf32>
    %25 = arith.addf %24, %23 : vector<16x192xf32>
    %26 = arith.divf %24, %25 : vector<16x192xf32>
    %27 = arith.mulf %19, %26 : vector<16x192xf32>
    %28 = arith.mulf %27, %21 : vector<16x192xf32>
    %c0_13 = arith.constant 0 : index
    %c0_14 = arith.constant 0 : index
    %29 = vector.load %arg8[%c0_13, %c0_14] : memref<16x64xf32, #tpu.memory_space<vmem>>, vector<16x64xf32>
    %30 = arith.truncf %28 : vector<16x192xf32> to vector<16x192xbf16>
    %c0_15 = arith.constant 0 : index
    %c0_16 = arith.constant 0 : index
    %31 = vector.load %arg6[%c0_15, %c0_16] : memref<192x64xbf16, #tpu.memory_space<vmem>>, vector<192x64xbf16>
    %cst_17 = arith.constant dense<0.000000e+00> : vector<16x64xf32>
    %32 = tpu.matmul %30, %31, %cst_17 {dimension_numbers = #tpu.dot_dimension_numbers<[1], [0], [0], [1], [0, 0, 1, 1], [], []>} : vector<16x192xbf16>, vector<192x64xbf16>, vector<16x64xf32> -> vector<16x64xf32>
    %33 = arith.addf %29, %32 : vector<16x64xf32>
    %c0_18 = arith.constant 0 : index
    %c0_19 = arith.constant 0 : index
    %34 = vector.load %arg8[%c0_18, %c0_19] : memref<16x64xf32, #tpu.memory_space<vmem>>, vector<16x64xf32>
    tpu.vector_store %arg8[%c0_18, %c0_19], %33 {strides = array<i32>} : memref<16x64xf32, #tpu.memory_space<vmem>>, vector<16x64xf32>,
    %c0_i32_20 = arith.constant 0 : i32
    %35 = arith.cmpi eq, %arg1, %c0_i32_20 : i32
    %36 = arith.extui %35 : i1 to i32
    %c0_i32_21 = arith.constant 0 : i32
    %37 = arith.cmpi ne, %36, %c0_i32_21 : i32
    scf.if %37 {
      %c0_22 = arith.constant 0 : index
      %c0_23 = arith.constant 0 : index
      %38 = vector.load %arg8[%c0_22, %c0_23] : memref<16x64xf32, #tpu.memory_space<vmem>>, vector<16x64xf32>
      %39 = arith.addf %3, %38 : vector<16x64xf32>
      %c0_24 = arith.constant 0 : index
      %c0_25 = arith.constant 0 : index
      %40 = vector.load %arg7[%c0_24, %c0_25] : memref<16x64xf32, #tpu.memory_space<vmem>>, vector<16x64xf32>
      tpu.vector_store %arg7[%c0_24, %c0_25], %39 {strides = array<i32>} : memref<16x64xf32, #tpu.memory_space<vmem>>, vector<16x64xf32>,
    } else {
    }
    return
  }
  func.func @transform_0(%arg0: i32, %arg1: i32) -> (i32, i32) {
    %c0_i32 = arith.constant 0 : i32
    %c0_i32_0 = arith.constant 0 : i32
    return %arg0, %c0_i32 : i32, i32
  }
  func.func @transform_1(%arg0: i32, %arg1: i32) -> (i32, i32) {
    %c0_i32 = arith.constant 0 : i32
    %c0_i32_0 = arith.constant 0 : i32
    %c0_i32_1 = arith.constant 0 : i32
    return %c0_i32, %c0_i32_0 : i32, i32
  }
  func.func @transform_2(%arg0: i32, %arg1: i32) -> (i32, i32) {
    %c0_i32 = arith.constant 0 : i32
    %c0_i32_0 = arith.constant 0 : i32
    return %c0_i32, %arg1 : i32, i32
  }
  func.func @transform_3(%arg0: i32, %arg1: i32) -> (i32, i32) {
    %c0_i32 = arith.constant 0 : i32
    %c0_i32_0 = arith.constant 0 : i32
    return %c0_i32, %arg1 : i32, i32
  }
  func.func @transform_4(%arg0: i32, %arg1: i32) -> (i32, i32) {
    %c0_i32 = arith.constant 0 : i32
    %c0_i32_0 = arith.constant 0 : i32
    return %arg1, %c0_i32 : i32, i32
  }
  func.func @transform_5(%arg0: i32, %arg1: i32) -> (i32, i32) {
    %c0_i32 = arith.constant 0 : i32
    %c0_i32_0 = arith.constant 0 : i32
    return %arg0, %c0_i32 : i32, i32
  }
}

module attributes {stable_mosaic.version = 11 : i64} {
  func.func @_norm_matmul_kernel(%arg0: i32, %arg1: i32, %arg2: memref<16x64xf32, #tpu.memory_space<vmem>>, %arg3: memref<1x64xf32, #tpu.memory_space<vmem>>, %arg4: memref<64x256xbf16, #tpu.memory_space<vmem>>, %arg5: memref<16x256xf32, #tpu.memory_space<vmem>>) attributes {dimension_semantics = [#tpu.dimension_semantics<parallel>, #tpu.dimension_semantics<parallel>], iteration_bounds = array<i64: 1, 1>, scalar_prefetch = 0 : i64, scratch_operands = 0 : i64, tpu.core_type = #tpu.core_type<tc>, window_params = [{transform_indices = @transform_0, window_bounds = array<i64: 16, 64>}, {pipeline_mode = #tpu.pipeline_mode<synchronous>, transform_indices = @transform_1, window_bounds = array<i64: 1, 64>}, {transform_indices = @transform_2, window_bounds = array<i64: 64, 256>}, {transform_indices = @transform_3, window_bounds = array<i64: 16, 256>}]} {
    %c0 = arith.constant 0 : index
    %c0_0 = arith.constant 0 : index
    %0 = vector.load %arg2[%c0, %c0_0] : memref<16x64xf32, #tpu.memory_space<vmem>>, vector<16x64xf32>
    %1 = arith.mulf %0, %0 : vector<16x64xf32>
    %cst = arith.constant dense<0.000000e+00> : vector<16xf32>
    %2 = vector.multi_reduction <add>, %1, %cst [1] : vector<16x64xf32> to vector<16xf32>
    %3 = vector.shape_cast %2 : vector<16xf32> to vector<16x1xf32>
    %cst_1 = arith.constant 6.400000e+01 : f32
    %4 = vector.broadcast %cst_1 : f32 to vector<16x1xf32>
    %5 = arith.divf %3, %4 : vector<16x1xf32>
    %cst_2 = arith.constant 9.99999974E-6 : f32
    %6 = vector.broadcast %cst_2 : f32 to vector<16x1xf32>
    %7 = arith.addf %5, %6 : vector<16x1xf32>
    %8 = math.rsqrt %7 : vector<16x1xf32>
    %9 = vector.broadcast %8 : vector<16x1xf32> to vector<16x64xf32>
    %10 = arith.mulf %0, %9 : vector<16x64xf32>
    %c0_3 = arith.constant 0 : index
    %c0_4 = arith.constant 0 : index
    %11 = vector.load %arg3[%c0_3, %c0_4] : memref<1x64xf32, #tpu.memory_space<vmem>>, vector<1x64xf32>
    %12 = vector.broadcast %11 : vector<1x64xf32> to vector<16x64xf32>
    %13 = arith.mulf %10, %12 : vector<16x64xf32>
    %14 = arith.truncf %13 : vector<16x64xf32> to vector<16x64xbf16>
    %c0_5 = arith.constant 0 : index
    %c0_6 = arith.constant 0 : index
    %15 = vector.load %arg4[%c0_5, %c0_6] : memref<64x256xbf16, #tpu.memory_space<vmem>>, vector<64x256xbf16>
    %cst_7 = arith.constant dense<0.000000e+00> : vector<16x256xf32>
    %16 = tpu.matmul %14, %15, %cst_7 {dimension_numbers = #tpu.dot_dimension_numbers<[1], [0], [0], [1], [0, 0, 1, 1], [], []>} : vector<16x64xbf16>, vector<64x256xbf16>, vector<16x256xf32> -> vector<16x256xf32>
    %c0_8 = arith.constant 0 : index
    %c0_9 = arith.constant 0 : index
    %17 = vector.load %arg5[%c0_8, %c0_9] : memref<16x256xf32, #tpu.memory_space<vmem>>, vector<16x256xf32>
    tpu.vector_store %arg5[%c0_8, %c0_9], %16 {strides = array<i32>} : memref<16x256xf32, #tpu.memory_space<vmem>>, vector<16x256xf32>,
    return
  }
  func.func @transform_0(%arg0: i32, %arg1: i32) -> (i32, i32) {
    %c0_i32 = arith.constant 0 : i32
    %c0_i32_0 = arith.constant 0 : i32
    return %arg0, %c0_i32 : i32, i32
  }
  func.func @transform_1(%arg0: i32, %arg1: i32) -> (i32, i32) {
    %c0_i32 = arith.constant 0 : i32
    %c0_i32_0 = arith.constant 0 : i32
    %c0_i32_1 = arith.constant 0 : i32
    return %c0_i32, %c0_i32_0 : i32, i32
  }
  func.func @transform_2(%arg0: i32, %arg1: i32) -> (i32, i32) {
    %c0_i32 = arith.constant 0 : i32
    %c0_i32_0 = arith.constant 0 : i32
    return %c0_i32, %arg1 : i32, i32
  }
  func.func @transform_3(%arg0: i32, %arg1: i32) -> (i32, i32) {
    %c0_i32 = arith.constant 0 : i32
    return %arg0, %arg1 : i32, i32
  }
}

</mosaic_0001>

<bundles_post_ra>
// kernel: transformer_forward.9
= control target key start
LH: loop header
LB: loop body
LE: loop exit
PB: predicated region body
PF: predicated region fallthrough
CT: control target
= control target key end

     0   :  { %8 = vsyncpa [#allocation3], 0  ;;  %s356_s0 = inlined_call_operand.vmem [shape: f32[16,64], index: 0, kind: input, shape index: {}]   ;;  %s357_s1 = inlined_call_operand.hbm [shape: f32[1,64], index: 1, kind: input, shape index: {}]   ;;  %s358_s2 = inlined_call_operand.hbm [shape: bf16[64,192], index: 2, kind: input, shape index: {}]   ;;  %s359_s3 = inlined_call_operand.vmem [shape: f32[16,192], index: 3, kind: output, shape index: {}]  }
   0x1   :  { %s17_s14 = sshll.u32 %s357_s1, 4  ;;  %s18_s14 = int_to_ptr.hbm [resolvable:$true] %s17_s14 }
   0x2   :  { %9 = vsyncpa [#allocation5], 0  ;;  %s291_s15 = smov [#allocation2]   ;;  %s27_s19 = sshll.u32 %s358_s2, 4  ;;  %s28_s19 = int_to_ptr.hbm [resolvable:$true] %s27_s19 }
   0x3   :  { %s19_s16 = sshll.u32 %s291_s15, 4  ;;  %s292_s20 = smov [#allocation4]   ;;  %s20_s16 = int_to_ptr.vmem [resolvable:$true] %s19_s16 }
   0x4   :  { %22 = dma.hbm_to_vmem [thread:$0]  %s18_s14, 16, %s20_s16, [#allocation3]  }
   0x5   :  { %s29_s21 = sshll.u32 %s292_s20, 4  ;;  %s293_s22 = smov 128   ;;  %s30_s21 = int_to_ptr.vmem [resolvable:$true] %s29_s21 }
   0x6   :  { %s294_s23 = smov 8  }
   0x7   :  { %35 = dma.hbm_to_vmem [thread:$0]  %s28_s19, 1024, %s30_s21, [#allocation5], %s293_s22, %s293_s22, %s294_s23  }
   0x8   :  { %287 = dma.done.wait [#allocation3], 16  }
   0x9   :  { %288 = vsyncadd [#allocation3], 4294967280 }
   0xa   :  { %289 = dma.done.wait [#allocation5], 1024  }
   0xb   :  { %290 = vsyncadd [#allocation5], 4294966272  ;;  %v325_v0 = vld [vmem:[%s356_s0] sm:$0xff]  ;;  %vm49_vm0 = vcmask 523264   ;;  %v332_v2 = vld [vmem:[%s356_s0 + $0x8] sm:$0xff]  ;;  %v295_v6 = vmov 64.0  }
   0xc   :  { %v47_v1 = vmul.f32 %v325_v0, %v325_v0  ;;  %v48_v4 = vmul.f32 %v332_v2, %v332_v2  ;;  %233 = vrcp.f32 %v295_v6  ;;  %v211_v10 = vld [vmem:[#allocation4 + $0x30] sm:$0xf]  ;;  %v226_v11 = vld [vmem:[#allocation4 + $0x34] sm:$0xf0]  ;;  %v225_v12 = vld [vmem:[#allocation4 + $0x34] sm:$0xf] }
   0xd   :  { %v212_v13 = vor.u32 %v226_v11, %v211_v10  ;;  %v213_v14 = vld [vmem:[#allocation4 + $0x38] sm:$0xf0]  ;;  %v203_v17 = vld [vmem:[#allocation4 + $0x20] sm:$0xf]  ;;  %v224_v18 = vld [vmem:[#allocation4 + $0x24] sm:$0xf0] }
   0xe   :  { %v50_v3 = vsel %vm49_vm0, %v47_v1, 0.0  ;;  %v53_v5 = vsel %vm49_vm0, %v48_v4, 0.0  ;;  %v216_v15 = vor.u32 %v225_v12, %v213_v14  ;;  %v223_v19 = vld [vmem:[#allocation4 + $0x24] sm:$0xf]  ;;  %v204_v20 = vor.u32 %v224_v18, %v203_v17  ;;  %v205_v21 = vld [vmem:[#allocation4 + $0x28] sm:$0xf0] }
   0xf   :  { %51 = vadd.xlane.f32.xlu0 %v50_v3  ;;  %151 = vmatpush.bf16.msra.mxu0 %v212_v13  ;;  %v208_v22 = vor.u32 %v223_v19, %v205_v21  ;;  %v195_v24 = vld [vmem:[#allocation4 + $0x10] sm:$0xf]  ;;  %v222_v25 = vld [vmem:[#allocation4 + $0x14] sm:$0xf0]  ;;  %v221_v26 = vld [vmem:[#allocation4 + $0x14] sm:$0xf] }
  0x10   :  { %165 = vmatpush.bf16.msra.mxu1 %v216_v15  ;;  %v196_v27 = vor.u32 %v222_v25, %v195_v24  ;;  %v197_v28 = vld [vmem:[#allocation4 + $0x18] sm:$0xf0]  ;;  %v187_v31 = vld [vmem:[#allocation4] sm:$0xf]  ;;  %v220_v32 = vld [vmem:[#allocation4 + $0x4] sm:$0xf0] }
  0x11   :  { %v200_v29 = vor.u32 %v221_v26, %v197_v28  ;;  %v219_v33 = vld [vmem:[#allocation4 + $0x4] sm:$0xf]  ;;  %v188_v34 = vor.u32 %v220_v32, %v187_v31  ;;  %v189_v35 = vld [vmem:[#allocation4 + $0x8] sm:$0xf0]  ;;  %v232_v57 = vld [vmem:[#allocation2] ss:$0 sm:$0xff] }
  0x12   :  { %v234_v7 = vpop.eup %233  ;;  %v192_v37 = vor.u32 %v219_v33, %v189_v35 }
  0x13   :  { %v57_v8 = vmul.f32 64.0, %v234_v7  ;;  %152 = vmatpush.bf16.msra.mxu0 %v204_v20  ;;  %vm61_vm1 = vweird.f32 %v234_v7 }
  0x14   :  { %166 = vmatpush.bf16.msra.mxu1 %v208_v22 }
  0x15   :  { %v58_v9 = vsub.f32 1.0, %v57_v8 }
  0x17   :  { %54 = vadd.xlane.f32.xlu0 %v53_v5  ;;  %v59_v16 = vmul.f32 %v234_v7, %v58_v9  ;;  %153 = vmatpush.bf16.msra.mxu0 %v196_v27 }
  0x18   :  { %167 = vmatpush.bf16.msra.mxu1 %v200_v29 }
  0x19   :  { %v60_v23 = vadd.f32 %v234_v7, %v59_v16 }
  0x1b   :  { %v62_v30 = vsel %vm61_vm1, %v234_v7, %v60_v23  ;;  %154 = vmatpush.bf16.msra.mxu0 %v188_v34 }
  0x1c   :  { %168 = vmatpush.bf16.msra.mxu1 %v192_v37 }
  0x82   :  { %v52_v36 = vpop.xlane.xlu0 %51 }
  0x83   :  { %v63_v38 = vmul.f32 %v62_v30, %v52_v36 }
  0x85   :  { %v65_v39 = vadd.f32 1e-05, %v63_v38 }
  0x87   :  { %235 = vrsqrt.f32 %v65_v39  ;;  %vm73_vm3 = vweird.f32 %v65_v39 }
  0x8a   :  { %v55_v40 = vpop.xlane.xlu0 %54 }
  0x8b   :  { %v64_v41 = vmul.f32 %v62_v30, %v55_v40 }
  0x8d   :  { %v236_v42 = vpop.eup %235  ;;  %v66_v43 = vadd.f32 1e-05, %v64_v41 }
  0x8e   :  { %v68_v44 = vmul.f32 %v236_v42, %v65_v39  ;;  %vm74_vm2 = vweird.f32 %v236_v42 }
  0x8f   :  { %237 = vrsqrt.f32 %v66_v43  ;;  %vm75_vm4 = vmor %vm73_vm3, %vm74_vm2  ;;  %vm83_vm6 = vweird.f32 %v66_v43 }
  0x90   :  { %v69_v45 = vmul.f32 %v236_v42, %v68_v44 }
  0x92   :  { %v70_v46 = vmul.f32 0.5, %v69_v45 }
  0x94   :  { %v71_v47 = vsub.f32 1.5, %v70_v46 }
  0x95   :  { %v238_v48 = vpop.eup %237 }
  0x96   :  { %v78_v49 = vmul.f32 %v238_v48, %v66_v43  ;;  %v72_v50 = vmul.f32 %v236_v42, %v71_v47  ;;  %vm84_vm5 = vweird.f32 %v238_v48 }
  0x97   :  { %vm85_vm7 = vmor %vm83_vm6, %vm84_vm5 }
  0x98   :  { %v79_v51 = vmul.f32 %v238_v48, %v78_v49  ;;  %v76_v53 = vsel %vm75_vm4, %v236_v42, %v72_v50 }
  0x99   :  { %v87_v56 = vmul.f32 %v76_v53, %v325_v0 }
  0x9a   :  { %v80_v52 = vmul.f32 0.5, %v79_v51 }
  0x9b   :  { %v93_v60 = vmul.f32 %v232_v57, %v87_v56 }
  0x9c   :  { %v81_v54 = vsub.f32 1.5, %v80_v52 }
  0x9e   :  { %v82_v55 = vmul.f32 %v238_v48, %v81_v54 }
  0xa0   :  { %v86_v58 = vsel %vm85_vm7, %v238_v48, %v82_v55 }
  0xa1   :  { %v88_v59 = vmul.f32 %v86_v58, %v332_v2 }
  0xa3   :  { %v94_v61 = vmul.f32 %v232_v57, %v88_v59 }
  0xa5   :  { %v95_v62 = vpack.c.bf16 %v94_v61, %v93_v60 }
  0xa7   :  { %217 = vmatmul.msk.bf16.vlgmr.msra.gmra.mxu0 %vm49_vm0, %v95_v62  ;;  %218 = vmatmul.msk.bf16.vlgmr.msra.gmra.mxu1 %vm49_vm0, %v95_v62 }
 0x124   :  { %v156_v63 = vpop.f32.mrf.mxu0  ;;  %v170_v1 = vpop.f32.mrf.mxu1 }
 0x125   :  { %175 = vst [vmem:[%s359_s3] sm:$0xff] %v156_v63 }
 0x126   :  { %176 = vst.msk [vmem:[%s359_s3 + $0x8] sm:$0xff] %vm49_vm0, %v170_v1 }
 0x12c   :  { %v158_v0 = vpop.f32.mrf.mxu0  ;;  %v172_v2 = vpop.f32.mrf.mxu1 }
 0x12d   :  { %177 = vst [vmem:[%s359_s3 + $0x10] sm:$0xff] %v158_v0 }
 0x12e   :  { %178 = vst.msk [vmem:[%s359_s3 + $0x18] sm:$0xff] %vm49_vm0, %v172_v2 }
 0x12f   :  { %183 = vsyncpa [#allocation3], 1 }
 0x130   :  { %184 = vsyncpa [#allocation5], 1 }

// kernel: transformer_forward.10
= control target key start
LH: loop header
LB: loop body
LE: loop exit
PB: predicated region body
PF: predicated region fallthrough
CT: control target
= control target key end

     0   :  { %s587_s12 = smov 0   ;;  %s589_s13 = smov 0   ;;  %s644_s0 = inlined_call_operand.vmem [shape: f32[8,8,16], index: 0, kind: input, shape index: {}]   ;;  %s645_s1 = inlined_call_operand.vmem [shape: f32[8,8,16], index: 1, kind: input, shape index: {}]   ;;  %s646_s2 = inlined_call_operand.vmem [shape: f32[8,8,16], index: 2, kind: input, shape index: {}]   ;;  %s647_s3 = inlined_call_operand.vmem [shape: f32[8,8,16], index: 3, kind: output, shape index: {}]  }
   0x1   :  { %s591_s14 = smov 0  }
   0x2 LB: > { %s32_s15 = sadd.s32 1, %s558_s13  ;;  %p495_p0 = scmp.ge.s32.totalorder %s562_s14, 1  ;;  %s562_s14 = sphi %s591_s14, %s13_s14   ;;  %s558_s13 = sphi %s589_s13, %s649_s13   ;;  %s554_s12 = sphi %s587_s12, %s648_s12  }
   0x3   : > { %p34_p1 = scmp.ge.s32.totalorder %s32_s15, 8  ;;  %p190_p2 = scmp.lt.s32.totalorder %s562_s14, 9 }
   0x5   : > { %s651_s15 = smov (%p34_p1, %s32_s15), 0  ;;  %p191_p3 = pnand %p495_p0, %p190_p2 }
   0x6   : > { %p232_p4 = scmp.lt.s32.totalorder (!%p191_p3), %s554_s12, 7 }
   0x7   : > { %194 = sbr.rel (%p191_p3) target bundleno = 628 (0x274), region = 32 }
   0xc   : > { %s653_s12 = smov (!%p232_p4, %s554_s12), 7  ;;  %vm268_vm0 = vcmask 130048   ;;  %vm265_vm1 = vcmask 7168   ;;  %v564_v5 = vmov -inf   ;;  %v302_v6 = vlaneseq }
   0xd   : > { %s605_s16 = sshll.u32 %s653_s12, 3  ;;  %266 = vst.msk [vmem:[#allocation2] sm:$0xff] %vm265_vm1, %v564_v5  ;;  %vm313_vm3 = vcmask 64512   ;;  %v565_v14 = vmov 0   ;;  %v566_v15 = vmov 0.0   ;;  %vm350_vm4 = vcmask 1043456  }
   0xe   : > { %s245_s19 = scalar_lea.vmem %s645_s1, %s605_s16  ;;  %s238_s22 = scalar_lea.vmem %s644_s0, %s605_s16  ;;  %v303_v7 = vshrl.u32 %v302_v6, 7  ;;  %v307_v8 = vand.u32 127, %v302_v6  ;;  %531 = vset.pattern.permute.xlu0 %v565_v14  ;;  %532 = vset.pattern.permute.xlu1 %v565_v14  ;;  %267 = vst.msk [vmem:[#allocation3] sm:$0xff] %vm265_vm1, %v566_v15 }
   0xf   : > { %v279_v0 = vld [vmem:[%s245_s19] sm:$0xff]  ;;  %533 = vset.pattern.permute.xlu2 %v565_v14  ;;  %269 = vst.msk [vmem:[#allocation4] sm:$0xff] %vm268_vm0, %v566_v15  ;;  %s252_s25 = scalar_lea.vmem %s646_s2, %s605_s16  ;;  %s259_s28 = scalar_lea.vmem %s647_s3, %s605_s16 }
  0x10   : > { %v280_v1 = vpack.c.bf16 %v279_v0, %v279_v0  ;;  %v277_v3 = vld [vmem:[%s238_s22] sm:$0xff]  ;;  %vm310_vm2 = vcmp.ge.s32.totalorder %v303_v7, %v307_v8 }
  0x11   : > { %v278_v4 = vpack.c.bf16 %v277_v3, %v277_v3  ;;  %v345_v20 = vld [vmem:[%s252_s25] sm:$0xff] }
  0x12   : > { %v286_v2 = vsel %vm268_vm0, %v280_v1, 0  ;;  %v346_v21 = vpack.c.bf16 %v345_v20, %v345_v20 }
  0x13   : > { %295 = vmatpush.bf16.xpose.msra.mxu0 %v286_v2 }
  0x14   : > { %v312_v16 = vld [vmem:[#allocation2] sm:$0xff]  ;;  %v352_v22 = vsel %vm350_vm4, %v346_v21, 0 }
  0x15   : > { %361 = vmatpush.bf16.msra.mxu1 %v352_v22  ;;  %v329_v31 = vld [vmem:[#allocation3] sm:$0xff] }
  0x16   : > { %v337_v39 = vld [vmem:[#allocation4] sm:$0xff] }
  0x1a   : > { %500 = vmatmul.msk.bf16.vlgmr.msra.gmra.mxu0 %vm268_vm0, %v278_v4 }
  0x97   : > { %v297_v9 = vpop.f32.mrf.mxu0 }
  0x98   : > { %v301_v10 = vmul.f32 0.25, %v297_v9 }
  0x9a   : > { %v311_v11 = vsel %vm310_vm2, %v301_v10, -inf }
  0x9b   : > { %v314_v12 = vsel %vm313_vm3, %v311_v11, -inf }
  0x9c   : > { %315 = vmax.xlane.f32.xlu0 %v314_v12 }
  0x9f   : > { %v299_v13 = vpop.f32.mrf.mxu0 }
 0x10f   : > { %v316_v17 = vpop.xlane.xlu0 %315 }
 0x110   : > { %v317_v18 = vmax.f32 %v312_v16, %v316_v17 }
 0x112   : > { %v318_v19 = vsub.f32 %v312_v16, %v317_v18  ;;  %369 = vst.msk [vmem:[#allocation2] sm:$0xff] %vm265_vm1, %v317_v18  ;;  %323 = vperm.xlu0 %531, %v317_v18  }
 0x114   : > { %v319_v29 = vmul.f32 1.442695, %v318_v19 }
 0x184   : > { %v324_v23 = vpop.permute.xlu0 %323 }
 0x185   : > { %v326_v24 = vsub.f32 %v311_v11, %v324_v23 }
 0x187   : > { %v327_v25 = vmul.f32 1.442695, %v326_v24 }
 0x189   : > { %534 = vpow2.f32 %v327_v25 }
 0x18a   : > { %536 = vpow2.f32 %v319_v29 }
 0x18f   : > { %v535_v26 = vpop.eup %534 }
 0x190   : > { %v331_v27 = vsel %vm313_vm3, %v535_v26, 0.0  ;;  %v344_v28 = vpack.c.bf16 %v535_v26, %v535_v26  ;;  %v537_v30 = vpop.eup %536 }
 0x191   : > { %332 = vadd.xlane.f32.xlu1 %v331_v27  ;;  %v330_v32 = vmul.f32 %v537_v30, %v329_v31 }
 0x192   : > { %501 = vmatmul.msk.bf16.vlgmr.msra.gmra.mxu1 %vm313_vm3, %v344_v28 }
 0x1aa   : > { %340 = vperm.xlu1 %532, %v537_v30  }
 0x204   : > { %v333_v33 = vpop.xlane.xlu1 %332 }
 0x205   : > { %v334_v34 = vadd.f32 %v333_v33, %v330_v32 }
 0x207   : > { %336 = vst.msk [vmem:[#allocation3] sm:$0xff] %vm265_vm1, %v334_v34 }
 0x20e   : > { %v374_v35 = vld [vmem:[#allocation3] sm:$0xff] }
 0x20f   : > { %v363_v36 = vpop.f32.mrf.mxu1  ;;  %538 = vrcp.f32 %v374_v35 }
 0x215   : > { %v539_v37 = vpop.eup %538 }
 0x216   : > { %378 = vperm.xlu2 %533, %v539_v37  }
 0x217   : > { %v365_v38 = vpop.f32.mrf.mxu1 }
 0x21c   : > { %v341_v40 = vpop.permute.xlu1 %340 }
 0x21d   : > { %v343_v41 = vmul.f32 %v341_v40, %v337_v39 }
 0x21f   : > { %v367_v42 = vadd.f32 %v363_v36, %v343_v41 }
 0x221   : > { %368 = vst.msk [vmem:[#allocation4] sm:$0xff] %vm268_vm0, %v367_v42 }
 0x228   : > { %v373_v43 = vld [vmem:[#allocation4] sm:$0xff] }
 0x270   : > { %v379_v44 = vpop.permute.xlu2 %378 }
 0x271   : > { %v381_v45 = vmul.f32 %v379_v44, %v373_v43 }
 0x273   : > { %383 = vst.msk [vmem:[%s259_s28] sm:$0xff] %vm268_vm0, %v381_v45 }
 0x274 PF: > { %s13_s14 = sadd.s32 1, %s562_s14   ;;  %s648_s12 = smov %s558_s13 }
 0x275   : > { %p10_p5 = scmp.ge.s32.totalorder %s13_s14, 10   ;;  %s649_s13 = smov %s651_s15 }
 0x277   :  { %12 = sbr.rel (!%p10_p5) target bundleno = 2 (0x2), region = 80 }

// kernel: transformer_forward.11
= control target key start
LH: loop header
LB: loop body
LE: loop exit
PB: predicated region body
PF: predicated region fallthrough
CT: control target
= control target key end

     0   :  { %vm50_vm0 = vcmask 523264   ;;  %s149_s1 = inlined_call_operand.vmem [shape: bf16[64,64], index: 1, kind: input, shape index: {}]   ;;  %s150_s0 = inlined_call_operand.vmem [shape: f32[16,64], index: 0, kind: input, shape index: {}]   ;;  %s151_s2 = inlined_call_operand.vmem [shape: f32[16,64], index: 2, kind: input, shape index: {}]   ;;  %s152_s3 = inlined_call_operand.vmem [shape: f32[16,64], index: 3, kind: output, shape index: {}]  }
   0x1   :  { %v98_v0 = vld [vmem:[%s149_s1 + $0x18] sm:$0xff]  ;;  %v97_v1 = vld [vmem:[%s149_s1 + $0x10] sm:$0xff]  ;;  %v96_v2 = vld [vmem:[%s149_s1 + $0x8] sm:$0xff] }
   0x2   :  { %58 = vmatpush.bf16.msra.mxu0 %v98_v0  ;;  %v95_v3 = vld [vmem:[%s149_s1] sm:$0xff]  ;;  %v16_v5 = vld [vmem:[%s150_s0 + $0x8] sm:$0xff] }
   0x3   :  { %v15_v4 = vld [vmem:[%s150_s0] sm:$0xff]  ;;  %v69_v10 = vld [vmem:[%s151_s2 + $0x8] sm:$0xff] }
   0x4   :  { %v17_v6 = vpack.c.bf16 %v16_v5, %v15_v4  ;;  %v68_v7 = vld [vmem:[%s151_s2] sm:$0xff] }
   0x6   :  { %59 = vmatpush.bf16.msra.mxu0 %v97_v1 }
   0xa   :  { %60 = vmatpush.bf16.msra.mxu0 %v96_v2 }
   0xe   :  { %61 = vmatpush.bf16.msra.mxu0 %v95_v3 }
  0x11   :  { %94 = vmatmul.msk.bf16.vlgmr.msra.gmra.mxu0 %vm50_vm0, %v17_v6 }
  0x8e   :  { %v63_v8 = vpop.f32.mrf.mxu0 }
  0x8f   :  { %v70_v9 = vadd.f32 %v68_v7, %v63_v8 }
  0x91   :  { %72 = vst.msk [vmem:[%s152_s3] sm:$0xff] %vm50_vm0, %v70_v9 }
  0x96   :  { %v65_v11 = vpop.f32.mrf.mxu0 }
  0x97   :  { %v71_v12 = vadd.f32 %v69_v10, %v65_v11 }
  0x99   :  { %73 = vst.msk [vmem:[%s152_s3 + $0x8] sm:$0xff] %vm50_vm0, %v71_v12 }

// kernel: transformer_forward.13
= control target key start
LH: loop header
LB: loop body
LE: loop exit
PB: predicated region body
PF: predicated region fallthrough
CT: control target
= control target key end

     0   :  { %vm19_vm0 = vcmask 523264   ;;  %v203_v6 = vmov 64.0   ;;  %s309_s0 = inlined_call_operand.vmem [shape: f32[16,64], index: 0, kind: input, shape index: {}]   ;;  %s310_s1 = inlined_call_operand.vmem [shape: f32[1,64], index: 1, kind: input, shape index: {}]   ;;  %s311_s2 = inlined_call_operand.vmem [shape: bf16[64,192], index: 2, kind: input, shape index: {}]   ;;  %s312_s3 = inlined_call_operand.vmem [shape: f32[16,192], index: 3, kind: output, shape index: {}]  }
   0x1   :  { %v227_v0 = vld [vmem:[%s309_s0] sm:$0xff]  ;;  %v234_v2 = vld [vmem:[%s309_s0 + $0x8] sm:$0xff]  ;;  %197 = vrcp.f32 %v203_v6  ;;  %v179_v10 = vld [vmem:[%s311_s2 + $0x30] sm:$0xf] }
   0x2   :  { %v17_v1 = vmul.f32 %v227_v0, %v227_v0  ;;  %v18_v4 = vmul.f32 %v234_v2, %v234_v2  ;;  %v194_v11 = vld [vmem:[%s311_s2 + $0x34] sm:$0xf0]  ;;  %v193_v12 = vld [vmem:[%s311_s2 + $0x34] sm:$0xf]  ;;  %v181_v14 = vld [vmem:[%s311_s2 + $0x38] sm:$0xf0] }
   0x3   :  { %v180_v13 = vor.u32 %v194_v11, %v179_v10  ;;  %v184_v15 = vor.u32 %v193_v12, %v181_v14  ;;  %v171_v17 = vld [vmem:[%s311_s2 + $0x20] sm:$0xf]  ;;  %v192_v18 = vld [vmem:[%s311_s2 + $0x24] sm:$0xf0]  ;;  %v191_v19 = vld [vmem:[%s311_s2 + $0x24] sm:$0xf] }
   0x4   :  { %v20_v3 = vsel %vm19_vm0, %v17_v1, 0.0  ;;  %v23_v5 = vsel %vm19_vm0, %v18_v4, 0.0  ;;  %v172_v20 = vor.u32 %v192_v18, %v171_v17  ;;  %v173_v21 = vld [vmem:[%s311_s2 + $0x28] sm:$0xf0]  ;;  %v163_v24 = vld [vmem:[%s311_s2 + $0x10] sm:$0xf] }
   0x5   :  { %21 = vadd.xlane.f32.xlu0 %v20_v3  ;;  %121 = vmatpush.bf16.msra.mxu0 %v180_v13  ;;  %v176_v22 = vor.u32 %v191_v19, %v173_v21  ;;  %v190_v25 = vld [vmem:[%s311_s2 + $0x14] sm:$0xf0]  ;;  %v189_v26 = vld [vmem:[%s311_s2 + $0x14] sm:$0xf]  ;;  %v165_v28 = vld [vmem:[%s311_s2 + $0x18] sm:$0xf0] }
   0x6   :  { %135 = vmatpush.bf16.msra.mxu1 %v184_v15  ;;  %v164_v27 = vor.u32 %v190_v25, %v163_v24  ;;  %v168_v29 = vor.u32 %v189_v26, %v165_v28  ;;  %v155_v31 = vld [vmem:[%s311_s2] sm:$0xf]  ;;  %v188_v32 = vld [vmem:[%s311_s2 + $0x4] sm:$0xf0]  ;;  %v187_v33 = vld [vmem:[%s311_s2 + $0x4] sm:$0xf] }
   0x7   :  { %v198_v7 = vpop.eup %197  ;;  %v156_v34 = vor.u32 %v188_v32, %v155_v31  ;;  %v157_v35 = vld [vmem:[%s311_s2 + $0x8] sm:$0xf0]  ;;  %v196_v57 = vld [vmem:[%s310_s1] ss:$0 sm:$0xff] }
   0x8   :  { %v27_v8 = vmul.f32 64.0, %v198_v7  ;;  %vm31_vm1 = vweird.f32 %v198_v7  ;;  %v160_v37 = vor.u32 %v187_v33, %v157_v35 }
   0x9   :  { %122 = vmatpush.bf16.msra.mxu0 %v172_v20 }
   0xa   :  { %v28_v9 = vsub.f32 1.0, %v27_v8  ;;  %136 = vmatpush.bf16.msra.mxu1 %v176_v22 }
   0xc   :  { %v29_v16 = vmul.f32 %v198_v7, %v28_v9 }
   0xd   :  { %24 = vadd.xlane.f32.xlu0 %v23_v5  ;;  %123 = vmatpush.bf16.msra.mxu0 %v164_v27 }
   0xe   :  { %v30_v23 = vadd.f32 %v198_v7, %v29_v16  ;;  %137 = vmatpush.bf16.msra.mxu1 %v168_v29 }
  0x10   :  { %v32_v30 = vsel %vm31_vm1, %v198_v7, %v30_v23 }
  0x11   :  { %124 = vmatpush.bf16.msra.mxu0 %v156_v34 }
  0x12   :  { %138 = vmatpush.bf16.msra.mxu1 %v160_v37 }
  0x78   :  { %v22_v36 = vpop.xlane.xlu0 %21 }
  0x79   :  { %v33_v38 = vmul.f32 %v32_v30, %v22_v36 }
  0x7b   :  { %v35_v39 = vadd.f32 1e-05, %v33_v38 }
  0x7d   :  { %199 = vrsqrt.f32 %v35_v39  ;;  %vm43_vm3 = vweird.f32 %v35_v39 }
  0x80   :  { %v25_v40 = vpop.xlane.xlu0 %24 }
  0x81   :  { %v34_v41 = vmul.f32 %v32_v30, %v25_v40 }
  0x83   :  { %v200_v42 = vpop.eup %199  ;;  %v36_v43 = vadd.f32 1e-05, %v34_v41 }
  0x84   :  { %v38_v44 = vmul.f32 %v200_v42, %v35_v39  ;;  %vm44_vm2 = vweird.f32 %v200_v42 }
  0x85   :  { %201 = vrsqrt.f32 %v36_v43  ;;  %vm45_vm4 = vmor %vm43_vm3, %vm44_vm2  ;;  %vm53_vm6 = vweird.f32 %v36_v43 }
  0x86   :  { %v39_v45 = vmul.f32 %v200_v42, %v38_v44 }
  0x88   :  { %v40_v46 = vmul.f32 0.5, %v39_v45 }
  0x8a   :  { %v41_v47 = vsub.f32 1.5, %v40_v46 }
  0x8b   :  { %v202_v48 = vpop.eup %201 }
  0x8c   :  { %v48_v49 = vmul.f32 %v202_v48, %v36_v43  ;;  %v42_v50 = vmul.f32 %v200_v42, %v41_v47  ;;  %vm54_vm5 = vweird.f32 %v202_v48 }
  0x8d   :  { %vm55_vm7 = vmor %vm53_vm6, %vm54_vm5 }
  0x8e   :  { %v49_v51 = vmul.f32 %v202_v48, %v48_v49  ;;  %v46_v53 = vsel %vm45_vm4, %v200_v42, %v42_v50 }
  0x8f   :  { %v57_v56 = vmul.f32 %v46_v53, %v227_v0 }
  0x90   :  { %v50_v52 = vmul.f32 0.5, %v49_v51 }
  0x91   :  { %v63_v60 = vmul.f32 %v196_v57, %v57_v56 }
  0x92   :  { %v51_v54 = vsub.f32 1.5, %v50_v52 }
  0x94   :  { %v52_v55 = vmul.f32 %v202_v48, %v51_v54 }
  0x96   :  { %v56_v58 = vsel %vm55_vm7, %v202_v48, %v52_v55 }
  0x97   :  { %v58_v59 = vmul.f32 %v56_v58, %v234_v2 }
  0x99   :  { %v64_v61 = vmul.f32 %v196_v57, %v58_v59 }
  0x9b   :  { %v65_v62 = vpack.c.bf16 %v64_v61, %v63_v60 }
  0x9d   :  { %185 = vmatmul.msk.bf16.vlgmr.msra.gmra.mxu0 %vm19_vm0, %v65_v62  ;;  %186 = vmatmul.msk.bf16.vlgmr.msra.gmra.mxu1 %vm19_vm0, %v65_v62 }
 0x11a   :  { %v126_v63 = vpop.f32.mrf.mxu0  ;;  %v140_v1 = vpop.f32.mrf.mxu1 }
 0x11b   :  { %145 = vst [vmem:[%s312_s3] sm:$0xff] %v126_v63 }
 0x11c   :  { %146 = vst.msk [vmem:[%s312_s3 + $0x8] sm:$0xff] %vm19_vm0, %v140_v1 }
 0x122   :  { %v128_v0 = vpop.f32.mrf.mxu0  ;;  %v142_v2 = vpop.f32.mrf.mxu1 }
 0x123   :  { %147 = vst [vmem:[%s312_s3 + $0x10] sm:$0xff] %v128_v0 }
 0x124   :  { %148 = vst.msk [vmem:[%s312_s3 + $0x18] sm:$0xff] %vm19_vm0, %v142_v2 }

// kernel: transformer_forward.17
= control target key start
LH: loop header
LB: loop body
LE: loop exit
PB: predicated region body
PF: predicated region fallthrough
CT: control target
= control target key end

     0   :  { %vm20_vm0 = vcmask 523264   ;;  %s345_s0 = inlined_call_operand.vmem [shape: f32[16,64], index: 0, kind: input, shape index: {}]   ;;  %s346_s1 = inlined_call_operand.vmem [shape: f32[1,64], index: 1, kind: input, shape index: {}]   ;;  %s347_s2 = inlined_call_operand.vmem [shape: bf16[64,256], index: 2, kind: input, shape index: {}]   ;;  %s348_s3 = inlined_call_operand.hbm [shape: f32[16,256], index: 3, kind: output, shape index: {}]  }
   0x1   :  { %v274_v0 = vld [vmem:[%s345_s0] sm:$0xff] }
   0x2   :  { %v18_v1 = vmul.f32 %v274_v0, %v274_v0 }
   0x3   :  { %8 = vsyncpa [#allocation3], 0  ;;  %v281_v2 = vld [vmem:[%s345_s0 + $0x8] sm:$0xff]  ;;  %v247_v6 = vmov 64.0   ;;  %v194_v10 = vld [vmem:[%s347_s2 + $0x30] sm:$0xf] }
   0x4   :  { %v21_v3 = vsel %vm20_vm0, %v18_v1, 0.0  ;;  %v19_v4 = vmul.f32 %v281_v2, %v281_v2  ;;  %215 = vrcp.f32 %v247_v6  ;;  %v209_v11 = vld [vmem:[%s347_s2 + $0x34] sm:$0xf0]  ;;  %v208_v12 = vld [vmem:[%s347_s2 + $0x34] sm:$0xf]  ;;  %s248_s20 = smov [#allocation2]  }
   0x5   :  { %22 = vadd.xlane.f32.xlu0 %v21_v3  ;;  %v195_v13 = vor.u32 %v209_v11, %v194_v10  ;;  %v196_v14 = vld [vmem:[%s347_s2 + $0x38] sm:$0xf0]  ;;  %v186_v17 = vld [vmem:[%s347_s2 + $0x20] sm:$0xf]  ;;  %v207_v18 = vld [vmem:[%s347_s2 + $0x24] sm:$0xf0] }
   0x6   :  { %v24_v5 = vsel %vm20_vm0, %v19_v4, 0.0  ;;  %v199_v15 = vor.u32 %v208_v12, %v196_v14  ;;  %v206_v19 = vld [vmem:[%s347_s2 + $0x24] sm:$0xf]  ;;  %v187_v20 = vor.u32 %v207_v18, %v186_v17  ;;  %v188_v21 = vld [vmem:[%s347_s2 + $0x28] sm:$0xf0]  ;;  %s154_s21 = sshll.u32 %s248_s20, 4  ;;  %s155_s21 = int_to_ptr.vmem [resolvable:$true] %s154_s21 }
   0x7   :  { %122 = vmatpush.bf16.msra.mxu0 %v195_v13  ;;  %v191_v22 = vor.u32 %v206_v19, %v188_v21  ;;  %v178_v24 = vld [vmem:[%s347_s2 + $0x10] sm:$0xf]  ;;  %v205_v25 = vld [vmem:[%s347_s2 + $0x14] sm:$0xf0]  ;;  %v204_v26 = vld [vmem:[%s347_s2 + $0x14] sm:$0xf] }
   0x8   :  { %136 = vmatpush.bf16.msra.mxu1 %v199_v15  ;;  %v179_v27 = vor.u32 %v205_v25, %v178_v24  ;;  %v180_v28 = vld [vmem:[%s347_s2 + $0x18] sm:$0xf0]  ;;  %v170_v31 = vld [vmem:[%s347_s2] sm:$0xf]  ;;  %v203_v32 = vld [vmem:[%s347_s2 + $0x4] sm:$0xf0] }
   0x9   :  { %v183_v29 = vor.u32 %v204_v26, %v180_v28  ;;  %v202_v33 = vld [vmem:[%s347_s2 + $0x4] sm:$0xf]  ;;  %v171_v34 = vor.u32 %v203_v32, %v170_v31  ;;  %v172_v35 = vld [vmem:[%s347_s2 + $0x8] sm:$0xf0]  ;;  %v214_v57 = vld [vmem:[%s346_s1] ss:$0 sm:$0xff] }
   0xa   :  { %v216_v7 = vpop.eup %215  ;;  %v175_v37 = vor.u32 %v202_v33, %v172_v35  ;;  %s156_s1 = sshll.u32 %s348_s3, 4  ;;  %s249_s24 = smov 256   ;;  %s157_s1 = int_to_ptr.hbm [resolvable:$true] %s156_s1 }
   0xb   :  { %v28_v8 = vmul.f32 64.0, %v216_v7  ;;  %123 = vmatpush.bf16.msra.mxu0 %v187_v20  ;;  %vm32_vm1 = vweird.f32 %v216_v7  ;;  %s250_s25 = smov 16  }
   0xc   :  { %137 = vmatpush.bf16.msra.mxu1 %v191_v22 }
   0xd   :  { %25 = vadd.xlane.f32.xlu0 %v24_v5  ;;  %v29_v9 = vsub.f32 1.0, %v28_v8 }
   0xf   :  { %v30_v16 = vmul.f32 %v216_v7, %v29_v9  ;;  %124 = vmatpush.bf16.msra.mxu0 %v179_v27 }
  0x10   :  { %138 = vmatpush.bf16.msra.mxu1 %v183_v29 }
  0x11   :  { %v31_v23 = vadd.f32 %v216_v7, %v30_v16 }
  0x13   :  { %v33_v30 = vsel %vm32_vm1, %v216_v7, %v31_v23  ;;  %125 = vmatpush.bf16.msra.mxu0 %v171_v34 }
  0x14   :  { %139 = vmatpush.bf16.msra.mxu1 %v175_v37 }
  0x78   :  { %v23_v36 = vpop.xlane.xlu0 %22 }
  0x79   :  { %v34_v38 = vmul.f32 %v33_v30, %v23_v36 }
  0x7b   :  { %v36_v39 = vadd.f32 1e-05, %v34_v38 }
  0x7d   :  { %217 = vrsqrt.f32 %v36_v39  ;;  %vm44_vm3 = vweird.f32 %v36_v39 }
  0x80   :  { %v26_v40 = vpop.xlane.xlu0 %25 }
  0x81   :  { %v35_v41 = vmul.f32 %v33_v30, %v26_v40 }
  0x83   :  { %v218_v42 = vpop.eup %217  ;;  %v37_v43 = vadd.f32 1e-05, %v35_v41 }
  0x84   :  { %v39_v44 = vmul.f32 %v218_v42, %v36_v39  ;;  %vm45_vm2 = vweird.f32 %v218_v42 }
  0x85   :  { %219 = vrsqrt.f32 %v37_v43  ;;  %vm46_vm4 = vmor %vm44_vm3, %vm45_vm2  ;;  %vm54_vm6 = vweird.f32 %v37_v43 }
  0x86   :  { %v40_v45 = vmul.f32 %v218_v42, %v39_v44 }
  0x88   :  { %v41_v46 = vmul.f32 0.5, %v40_v45 }
  0x8a   :  { %v42_v47 = vsub.f32 1.5, %v41_v46 }
  0x8b   :  { %v220_v48 = vpop.eup %219 }
  0x8c   :  { %v49_v49 = vmul.f32 %v220_v48, %v37_v43  ;;  %v43_v50 = vmul.f32 %v218_v42, %v42_v47  ;;  %vm55_vm5 = vweird.f32 %v220_v48 }
  0x8d   :  { %vm56_vm7 = vmor %vm54_vm6, %vm55_vm5 }
  0x8e   :  { %v50_v51 = vmul.f32 %v220_v48, %v49_v49  ;;  %v47_v53 = vsel %vm46_vm4, %v218_v42, %v43_v50 }
  0x8f   :  { %v58_v56 = vmul.f32 %v47_v53, %v274_v0 }
  0x90   :  { %v51_v52 = vmul.f32 0.5, %v50_v51 }
  0x91   :  { %v64_v60 = vmul.f32 %v214_v57, %v58_v56 }
  0x92   :  { %v52_v54 = vsub.f32 1.5, %v51_v52 }
  0x94   :  { %v53_v55 = vmul.f32 %v220_v48, %v52_v54 }
  0x96   :  { %v57_v58 = vsel %vm56_vm7, %v220_v48, %v53_v55 }
  0x97   :  { %v59_v59 = vmul.f32 %v57_v58, %v281_v2 }
  0x99   :  { %v65_v61 = vmul.f32 %v214_v57, %v59_v59 }
  0x9b   :  { %v66_v62 = vpack.c.bf16 %v65_v61, %v64_v60 }
  0x9d   :  { %200 = vmatmul.msk.bf16.vlgmr.msra.gmra.mxu0 %vm20_vm0, %v66_v62  ;;  %201 = vmatmul.msk.bf16.vlgmr.msra.gmra.mxu1 %vm20_vm0, %v66_v62 }
 0x11a   :  { %v127_v63 = vpop.f32.mrf.mxu0  ;;  %v141_v1 = vpop.f32.mrf.mxu1 }
 0x11b   :  { %146 = vst [vmem:[#allocation2] sm:$0xff] %v127_v63 }
 0x11c   :  { %147 = vst [vmem:[#allocation2 + $0x8] sm:$0xff] %v141_v1 }
 0x122   :  { %v129_v0 = vpop.f32.mrf.mxu0  ;;  %v143_v2 = vpop.f32.mrf.mxu1 }
 0x123   :  { %148 = vst [vmem:[#allocation2 + $0x10] sm:$0xff] %v129_v0 }
 0x124   :  { %149 = vst [vmem:[#allocation2 + $0x18] sm:$0xff] %v143_v2 }
 0x125   :  { %162 = dma.vmem_to_hbm [thread:$0]  %s155_s21, 512, %s157_s1, [#allocation3], %s249_s24, %s249_s24, %s250_s25  }
 0x126   :  { %245 = dma.done.wait [#allocation3], 512  }
 0x127   :  { %246 = vsyncadd [#allocation3], 4294966784 }
 0x128   :  { %167 = vsyncpa [#allocation3], 1 }

// kernel: transformer_forward.12
= control target key start
LH: loop header
LB: loop body
LE: loop exit
PB: predicated region body
PF: predicated region fallthrough
CT: control target
= control target key end

     0   :  { %vm25_vm0 = vcmask 523264   ;;  %v640_v6 = vmov 64.0   ;;  %s878_s0 = inlined_call_operand.vmem [shape: f32[16,64], index: 0, kind: input, shape index: {}]   ;;  %s879_s1 = inlined_call_operand.vmem [shape: f32[1,64], index: 1, kind: input, shape index: {}]   ;;  %s880_s2 = inlined_call_operand.vmem [shape: bf16[64,192], index: 2, kind: input, shape index: {}]   ;;  %s881_s3 = inlined_call_operand.vmem [shape: bf16[64,192], index: 3, kind: input, shape index: {}]   ;;  %s882_s4 = inlined_call_operand.vmem [shape: bf16[192,64], index: 4, kind: input, shape index: {}]   ;;  %s883_s5 = inlined_call_operand.vmem [shape: f32[16,64], index: 5, kind: output, shape index: {}]  }
   0x1   :  { %v675_v0 = vld [vmem:[%s878_s0] sm:$0xff]  ;;  %v682_v2 = vld [vmem:[%s878_s0 + $0x8] sm:$0xff]  ;;  %618 = vrcp.f32 %v640_v6  ;;  %v492_v10 = vld [vmem:[%s880_s2 + $0x30] sm:$0xf] }
   0x2   :  { %v30_v1 = vmul.f32 %v675_v0, %v675_v0  ;;  %v31_v4 = vmul.f32 %v682_v2, %v682_v2  ;;  %v594_v11 = vld [vmem:[%s880_s2 + $0x34] sm:$0xf0]  ;;  %v593_v12 = vld [vmem:[%s880_s2 + $0x34] sm:$0xf]  ;;  %v494_v14 = vld [vmem:[%s880_s2 + $0x38] sm:$0xf0] }
   0x3   :  { %v493_v13 = vor.u32 %v594_v11, %v492_v10  ;;  %v601_v15 = vld [vmem:[%s881_s3 + $0x34] sm:$0xf]  ;;  %v528_v16 = vld [vmem:[%s881_s3 + $0x38] sm:$0xf0]  ;;  %v497_v17 = vor.u32 %v593_v12, %v494_v14  ;;  %v484_v20 = vld [vmem:[%s880_s2 + $0x20] sm:$0xf] }
   0x4   :  { %v33_v3 = vsel %vm25_vm0, %v30_v1, 0.0  ;;  %v36_v5 = vsel %vm25_vm0, %v31_v4, 0.0  ;;  %v531_v18 = vor.u32 %v601_v15, %v528_v16  ;;  %v592_v21 = vld [vmem:[%s880_s2 + $0x24] sm:$0xf0]  ;;  %v591_v22 = vld [vmem:[%s880_s2 + $0x24] sm:$0xf] }
   0x5   :  { %34 = vadd.xlane.f32.xlu0 %v33_v3  ;;  %134 = vmatpush.bf16.msra.mxu2 %v493_v13  ;;  %v485_v23 = vor.u32 %v592_v21, %v484_v20  ;;  %v486_v24 = vld [vmem:[%s880_s2 + $0x28] sm:$0xf0]  ;;  %v599_v25 = vld [vmem:[%s881_s3 + $0x24] sm:$0xf]  ;;  %v476_v30 = vld [vmem:[%s880_s2 + $0x10] sm:$0xf] }
   0x6   :  { %148 = vmatpush.bf16.msra.mxu1 %v497_v17  ;;  %224 = vmatpush.bf16.msra.mxu3 %v531_v18  ;;  %v520_v26 = vld [vmem:[%s881_s3 + $0x28] sm:$0xf0]  ;;  %v489_v27 = vor.u32 %v591_v22, %v486_v24  ;;  %v590_v31 = vld [vmem:[%s880_s2 + $0x14] sm:$0xf0]  ;;  %v589_v32 = vld [vmem:[%s880_s2 + $0x14] sm:$0xf] }
   0x7   :  { %v619_v7 = vpop.eup %618  ;;  %v523_v28 = vor.u32 %v599_v25, %v520_v26  ;;  %v477_v33 = vor.u32 %v590_v31, %v476_v30  ;;  %v478_v34 = vld [vmem:[%s880_s2 + $0x18] sm:$0xf0]  ;;  %v597_v35 = vld [vmem:[%s881_s3 + $0x14] sm:$0xf]  ;;  %v468_v40 = vld [vmem:[%s880_s2] sm:$0xf] }
   0x8   :  { %v40_v8 = vmul.f32 64.0, %v619_v7  ;;  %vm44_vm1 = vweird.f32 %v619_v7  ;;  %v512_v36 = vld [vmem:[%s881_s3 + $0x18] sm:$0xf0]  ;;  %v481_v37 = vor.u32 %v589_v32, %v478_v34  ;;  %v588_v41 = vld [vmem:[%s880_s2 + $0x4] sm:$0xf0]  ;;  %v609_v26 = vld [vmem:[%s882_s4 + $0x30] sm:$0xff] }
   0x9   :  { %135 = vmatpush.bf16.msra.mxu2 %v485_v23  ;;  %v515_v38 = vor.u32 %v597_v35, %v512_v36  ;;  %v587_v42 = vld [vmem:[%s880_s2 + $0x4] sm:$0xf]  ;;  %v469_v44 = vor.u32 %v588_v41, %v468_v40  ;;  %v470_v45 = vld [vmem:[%s880_s2 + $0x8] sm:$0xf0]  ;;  %v526_v52 = vld [vmem:[%s881_s3 + $0x30] sm:$0xf] }
   0xa   :  { %v41_v9 = vsub.f32 1.0, %v40_v8  ;;  %149 = vmatpush.bf16.msra.mxu1 %v489_v27  ;;  %225 = vmatpush.bf16.msra.mxu3 %v523_v28  ;;  %v595_v46 = vld [vmem:[%s881_s3 + $0x4] sm:$0xf]  ;;  %v504_v47 = vld [vmem:[%s881_s3 + $0x8] sm:$0xf0]  ;;  %v473_v49 = vor.u32 %v587_v42, %v470_v45  ;;  %v610_v25 = vld [vmem:[%s882_s4 + $0x38] sm:$0xff] }
   0xb   :  { %v507_v50 = vor.u32 %v595_v46, %v504_v47  ;;  %v602_v53 = vld [vmem:[%s881_s3 + $0x34] sm:$0xf0]  ;;  %v518_v55 = vld [vmem:[%s881_s3 + $0x20] sm:$0xf]  ;;  %v600_v56 = vld [vmem:[%s881_s3 + $0x24] sm:$0xf0]  ;;  %421 = vmatpush.bf16.msra.mxu0 %v610_v25 }
   0xc   :  { %v42_v19 = vmul.f32 %v619_v7, %v41_v9  ;;  %v527_v54 = vor.u32 %v602_v53, %v526_v52  ;;  %v519_v57 = vor.u32 %v600_v56, %v518_v55  ;;  %v510_v59 = vld [vmem:[%s881_s3 + $0x10] sm:$0xf]  ;;  %v598_v60 = vld [vmem:[%s881_s3 + $0x14] sm:$0xf0]  ;;  %v502_v4 = vld [vmem:[%s881_s3] sm:$0xf] }
   0xd   :  { %37 = vadd.xlane.f32.xlu0 %v36_v5  ;;  %136 = vmatpush.bf16.msra.mxu2 %v477_v33  ;;  %v511_v1 = vor.u32 %v598_v60, %v510_v59  ;;  %v596_v5 = vld [vmem:[%s881_s3 + $0x4] sm:$0xf0]  ;;  %v614_v28 = vld [vmem:[%s882_s4 + $0x58] sm:$0xff]  ;;  %v613_v31 = vld [vmem:[%s882_s4 + $0x50] sm:$0xff] }
   0xe   :  { %v43_v29 = vadd.f32 %v619_v7, %v42_v19  ;;  %150 = vmatpush.bf16.msra.mxu1 %v481_v37  ;;  %226 = vmatpush.bf16.msra.mxu3 %v515_v38  ;;  %v617_v19 = vld [vmem:[%s879_s1] ss:$0 sm:$0xff]  ;;  %v608_v27 = vld [vmem:[%s882_s4 + $0x28] sm:$0xff]  ;;  %v606_v33 = vld [vmem:[%s882_s4 + $0x18] sm:$0xff] }
   0xf   :  { %422 = vmatpush.bf16.msra.mxu0 %v609_v26  ;;  %v612_v34 = vld [vmem:[%s882_s4 + $0x48] sm:$0xff]  ;;  %v605_v36 = vld [vmem:[%s882_s4 + $0x10] sm:$0xff] }
  0x10   :  { %v45_v39 = vsel %vm44_vm1, %v619_v7, %v43_v29  ;;  %v503_v7 = vor.u32 %v596_v5, %v502_v4  ;;  %v607_v29 = vld [vmem:[%s882_s4 + $0x20] sm:$0xff] }
  0x11   :  { %137 = vmatpush.bf16.msra.mxu2 %v469_v44  ;;  %v603_v44 = vld [vmem:[%s882_s4] sm:$0xff] }
  0x12   :  { %151 = vmatpush.bf16.msra.mxu1 %v473_v49  ;;  %227 = vmatpush.bf16.msra.mxu3 %v507_v50 }
  0x13   :  { %423 = vmatpush.bf16.msra.mxu0 %v608_v27 }
  0x15   :  { %210 = vmatpush.bf16.msrb.mxu2 %v527_v54 }
  0x16   :  { %439 = vmatpush.bf16.msrb.mxu1 %v614_v28 }
  0x17   :  { %424 = vmatpush.bf16.msra.mxu0 %v607_v29 }
  0x19   :  { %211 = vmatpush.bf16.msrb.mxu2 %v519_v57 }
  0x1a   :  { %440 = vmatpush.bf16.msrb.mxu1 %v613_v31 }
  0x1b   :  { %425 = vmatpush.bf16.msra.mxu0 %v606_v33 }
  0x1d   :  { %212 = vmatpush.bf16.msrb.mxu2 %v511_v1 }
  0x1e   :  { %441 = vmatpush.bf16.msrb.mxu1 %v612_v34 }
  0x1f   :  { %426 = vmatpush.bf16.msra.mxu0 %v605_v36 }
  0x21   :  { %213 = vmatpush.bf16.msrb.mxu2 %v503_v7 }
  0x78   :  { %v35_v43 = vpop.xlane.xlu0 %34 }
  0x79   :  { %v46_v48 = vmul.f32 %v45_v39, %v35_v43  ;;  %v604_v43 = vld [vmem:[%s882_s4 + $0x8] sm:$0xff] }
  0x7a   :  { %427 = vmatpush.bf16.msra.mxu0 %v604_v43 }
  0x7b   :  { %v48_v51 = vadd.f32 1e-05, %v46_v48 }
  0x7d   :  { %620 = vrsqrt.f32 %v48_v51  ;;  %vm56_vm3 = vweird.f32 %v48_v51 }
  0x7e   :  { %428 = vmatpush.bf16.msra.mxu0 %v603_v44 }
  0x80   :  { %v38_v58 = vpop.xlane.xlu0 %37 }
  0x81   :  { %v47_v61 = vmul.f32 %v45_v39, %v38_v58  ;;  %v611_v39 = vld [vmem:[%s882_s4 + $0x40] sm:$0xff] }
  0x82   :  { %442 = vmatpush.bf16.msrb.mxu1 %v611_v39 }
  0x83   :  { %v621_v62 = vpop.eup %620  ;;  %v49_v63 = vadd.f32 1e-05, %v47_v61 }
  0x84   :  { %v51_v3 = vmul.f32 %v621_v62, %v48_v51  ;;  %vm57_vm2 = vweird.f32 %v621_v62 }
  0x85   :  { %622 = vrsqrt.f32 %v49_v63  ;;  %vm58_vm4 = vmor %vm56_vm3, %vm57_vm2  ;;  %vm66_vm6 = vweird.f32 %v49_v63 }
  0x86   :  { %v52_v6 = vmul.f32 %v621_v62, %v51_v3 }
  0x88   :  { %v53_v8 = vmul.f32 0.5, %v52_v6 }
  0x8a   :  { %v54_v9 = vsub.f32 1.5, %v53_v8 }
  0x8b   :  { %v623_v10 = vpop.eup %622 }
  0x8c   :  { %v61_v11 = vmul.f32 %v623_v10, %v49_v63  ;;  %v55_v12 = vmul.f32 %v621_v62, %v54_v9  ;;  %vm67_vm5 = vweird.f32 %v623_v10 }
  0x8d   :  { %vm68_vm7 = vmor %vm66_vm6, %vm67_vm5 }
  0x8e   :  { %v62_v13 = vmul.f32 %v623_v10, %v61_v11  ;;  %v59_v15 = vsel %vm58_vm4, %v621_v62, %v55_v12 }
  0x8f   :  { %v70_v18 = vmul.f32 %v59_v15, %v675_v0 }
  0x90   :  { %v63_v14 = vmul.f32 0.5, %v62_v13 }
  0x91   :  { %v76_v22 = vmul.f32 %v617_v19, %v70_v18 }
  0x92   :  { %v64_v16 = vsub.f32 1.5, %v63_v14 }
  0x94   :  { %v65_v17 = vmul.f32 %v623_v10, %v64_v16 }
  0x96   :  { %v69_v20 = vsel %vm68_vm7, %v623_v10, %v65_v17 }
  0x97   :  { %v71_v21 = vmul.f32 %v69_v20, %v682_v2 }
  0x99   :  { %v77_v23 = vmul.f32 %v617_v19, %v71_v21 }
  0x9b   :  { %v78_v24 = vpack.c.bf16 %v77_v23, %v76_v22 }
  0x9d   :  { %498 = vmatmul.msk.bf16.vlgmr.msra.gmra.mxu2 %vm25_vm0, %v78_v24  ;;  %499 = vmatmul.msk.bf16.vlgmr.msra.gmra.mxu1 %vm25_vm0, %v78_v24 }
  0x9e   :  { %533 = vmatmul.msk.bf16.vlgmr.msra.gmra.mxu3 %vm25_vm0, %v78_v24 }
  0xad   :  { %532 = vmatmul.msk.bf16.vlgmr.msrb.gmra.mxu2 %vm25_vm0, %v78_v24 }
 0x11a   :  { %v808_v30 = vpop.f32.mrf.mxu1 }
 0x11b   :  { %v535_v32 = vmul.f32 -1.442695, %v808_v30 }
 0x11d   :  { %624 = vpow2.f32 %v535_v32 }
 0x120   :  { %v820_v35 = vpop.f32.mrf.mxu2 }
 0x121   :  { %v534_v37 = vmul.f32 -1.442695, %v820_v35  ;;  %v229_v5 = vpop.f32.mrf.mxu3 }
 0x122   :  { %v826_v38 = vpop.f32.mrf.mxu1 }
 0x123   :  { %v625_v40 = vpop.eup %624  ;;  %626 = vpow2.f32 %v534_v37  ;;  %v537_v41 = vmul.f32 -1.442695, %v826_v38 }
 0x124   :  { %v247_v42 = vadd.f32 1.0, %v625_v40 }
 0x125   :  { %628 = vpow2.f32 %v537_v41 }
 0x126   :  { %630 = vrcp.f32 %v247_v42  ;;  %v276_v60 = vand.u32 2147483648, %v247_v42  ;;  %vm270_vm9 = vweird.f32 %v247_v42  ;;  %v274_v63 = vand.u32 2147483647, %v247_v42 }
 0x128   :  { %v838_v45 = vpop.f32.mrf.mxu2  ;;  %v277_v7 = vor.u32 1.1754944e-38, %v276_v60  ;;  %vm275_vm12 = vcmp.eq.f32.partialorder %v274_v63, 8.507059e+37 }
 0x129   :  { %v627_v46 = vpop.eup %626  ;;  %v536_v47 = vmul.f32 -1.442695, %v838_v45  ;;  %v231_v37 = vpop.f32.mrf.mxu3 }
 0x12a   :  { %v246_v48 = vadd.f32 1.0, %v627_v46 }
 0x12b   :  { %v629_v49 = vpop.eup %628  ;;  %632 = vpow2.f32 %v536_v47 }
 0x12c   :  { %v631_v50 = vpop.eup %630  ;;  %634 = vrcp.f32 %v246_v48  ;;  %v249_v52 = vadd.f32 1.0, %v629_v49  ;;  %v259_v8 = vand.u32 2147483647, %v246_v48  ;;  %v261_v11 = vand.u32 2147483648, %v246_v48 }
 0x12d   :  { %v266_v51 = vmul.f32 %v631_v50, %v247_v42  ;;  %vm271_vm8 = vweird.f32 %v631_v50  ;;  %vm255_vm14 = vweird.f32 %v246_v48 }
 0x12e   :  { %636 = vrcp.f32 %v249_v52  ;;  %vm841_vm10 = vmor %vm270_vm9, %vm271_vm8  ;;  %v306_v12 = vand.u32 2147483648, %v249_v52  ;;  %v304_v15 = vand.u32 2147483647, %v249_v52  ;;  %vm851_vm1 = vcmp.eq.f32.partialorder %v259_v8, 8.507059e+37 }
 0x12f   :  { %v267_v53 = vsub.f32 1.0, %v266_v51  ;;  %vm300_vm2 = vweird.f32 %v249_v52  ;;  %v262_v23 = vor.u32 1.1754944e-38, %v261_v11 }
 0x130   :  { %v215_v21 = vpop.f32.mrf.mxu2  ;;  %v307_v24 = vor.u32 1.1754944e-38, %v306_v12  ;;  %vm305_vm4 = vcmp.eq.f32.partialorder %v304_v15, 8.507059e+37 }
 0x131   :  { %v633_v54 = vpop.eup %632  ;;  %v268_v55 = vmul.f32 %v631_v50, %v267_v53 }
 0x132   :  { %v635_v56 = vpop.eup %634  ;;  %v248_v57 = vadd.f32 1.0, %v633_v54 }
 0x133   :  { %v251_v58 = vmul.f32 %v635_v56, %v246_v48  ;;  %v269_v59 = vadd.f32 %v631_v50, %v268_v55  ;;  %vm256_vm11 = vweird.f32 %v635_v56 }
 0x134   :  { %638 = vrcp.f32 %v248_v57  ;;  %v637_v61 = vpop.eup %636  ;;  %vm847_vm15 = vmor %vm255_vm14, %vm256_vm11  ;;  %v291_v28 = vand.u32 2147483648, %v248_v57  ;;  %v289_v32 = vand.u32 2147483647, %v248_v57  ;;  %vm285_vm6 = vweird.f32 %v248_v57 }
 0x135   :  { %v252_v62 = vsub.f32 1.0, %v251_v58  ;;  %v296_v1 = vmul.f32 %v637_v61, %v249_v52  ;;  %v273_v6 = vsel %vm841_vm10, %v631_v50, %v269_v59  ;;  %vm301_vm13 = vweird.f32 %v637_v61 }
 0x136   :  { %v278_v16 = vsel %vm275_vm12, %v277_v7, %v273_v6  ;;  %vm302_vm3 = vmor %vm300_vm2, %vm301_vm13  ;;  %v292_v40 = vor.u32 1.1754944e-38, %v291_v28  ;;  %vm290_vm8 = vcmp.eq.f32.partialorder %v289_v32, 8.507059e+37  ;;  %v641_v50 = vmov 0.0  }
 0x137   :  { %v253_v4 = vmul.f32 %v635_v56, %v252_v62  ;;  %v297_v9 = vsub.f32 1.0, %v296_v1  ;;  %v311_v26 = vmul.f32 %v278_v16, %v808_v30  ;;  %26 = vst.msk [vmem:[#allocation2] sm:$0xff] %vm25_vm0, %v641_v50 }
 0x138   :  { %v217_v47 = vpop.f32.mrf.mxu2  ;;  %27 = vst.msk [vmem:[#allocation2 + $0x8] sm:$0xff] %vm25_vm0, %v641_v50 }
 0x139   :  { %v254_v10 = vadd.f32 %v635_v56, %v253_v4  ;;  %v298_v14 = vmul.f32 %v637_v61, %v297_v9  ;;  %v315_v39 = vmul.f32 %v311_v26, %v229_v5 }
 0x13a   :  { %v639_v13 = vpop.eup %638 }
 0x13b   :  { %v281_v17 = vmul.f32 %v639_v13, %v248_v57  ;;  %v299_v20 = vadd.f32 %v637_v61, %v298_v14  ;;  %v258_v22 = vsel %vm847_vm15, %v635_v56, %v254_v10  ;;  %vm286_vm5 = vweird.f32 %v639_v13 }
 0x13c   :  { %v263_v33 = vsel %vm851_vm1, %v262_v23, %v258_v22  ;;  %vm287_vm7 = vmor %vm285_vm6, %vm286_vm5 }
 0x13d   :  { %v282_v25 = vsub.f32 1.0, %v281_v17  ;;  %v303_v27 = vsel %vm302_vm3, %v637_v61, %v299_v20  ;;  %v310_v30 = vmul.f32 %v263_v33, %v820_v35 }
 0x13e   :  { %v308_v29 = vsel %vm305_vm4, %v307_v24, %v303_v27  ;;  %v318_v35 = vld [vmem:[#allocation2] sm:$0xff] }
 0x13f   :  { %v283_v31 = vmul.f32 %v639_v13, %v282_v25  ;;  %v313_v34 = vmul.f32 %v308_v29, %v826_v38  ;;  %v314_v48 = vmul.f32 %v310_v30, %v215_v21  ;;  %v319_v55 = vld [vmem:[#allocation2 + $0x8] sm:$0xff] }
 0x141   :  { %v284_v36 = vadd.f32 %v639_v13, %v283_v31  ;;  %v317_v41 = vmul.f32 %v313_v34, %v231_v37 }
 0x143   :  { %v288_v42 = vsel %vm287_vm7, %v639_v13, %v284_v36  ;;  %v321_v44 = vpack.c.bf16 %v317_v41, %v315_v39 }
 0x144   :  { %v293_v43 = vsel %vm290_vm8, %v292_v40, %v288_v42 }
 0x145   :  { %v312_v46 = vmul.f32 %v293_v43, %v838_v45  ;;  %586 = vmatmul.msk.bf16.vlgmr.msrb.gmra.mxu1 %vm25_vm0, %v321_v44 }
 0x147   :  { %v316_v38 = vmul.f32 %v312_v46, %v217_v47 }
 0x149   :  { %v320_v49 = vpack.c.bf16 %v316_v38, %v314_v48 }
 0x14b   :  { %429 = vmatmul.bf16.vlgmr.msra.gmra.mxu0 %v320_v49 }
 0x1c2   :  { %v444_v51 = vpop.f32.mrf.mxu1 }
 0x1c8   :  { %v430_v52 = vpop.f32.mrf.mxu0 }
 0x1c9   :  { %v445_v53 = vadd.f32 %v444_v51, %v430_v52 }
 0x1ca   :  { %v446_v45 = vpop.f32.mrf.mxu1 }
 0x1cb   :  { %v449_v54 = vadd.f32 %v445_v53, %v318_v35 }
 0x1cd   :  { %451 = vst.msk [vmem:[#allocation2] sm:$0xff] %vm25_vm0, %v449_v54 }
 0x1d0   :  { %v432_v56 = vpop.f32.mrf.mxu0 }
 0x1d1   :  { %v447_v57 = vadd.f32 %v446_v45, %v432_v56 }
 0x1d3   :  { %v450_v58 = vadd.f32 %v447_v57, %v319_v55 }
 0x1d4   :  { %v456_v59 = vld [vmem:[#allocation2] sm:$0xff] }
 0x1d5   :  { %v458_v60 = vadd.f32 %v456_v59, %v675_v0  ;;  %452 = vst.msk [vmem:[#allocation2 + $0x8] sm:$0xff] %vm25_vm0, %v450_v58 }
 0x1d7   :  { %460 = vst.msk [vmem:[%s883_s5] sm:$0xff] %vm25_vm0, %v458_v60 }
 0x1dc   :  { %v457_v61 = vld [vmem:[#allocation2 + $0x8] sm:$0xff] }
 0x1dd   :  { %v459_v62 = vadd.f32 %v457_v61, %v682_v2 }
 0x1df   :  { %461 = vst.msk [vmem:[%s883_s5 + $0x8] sm:$0xff] %vm25_vm0, %v459_v62 }

</bundles_post_ra>
